<compile_context>
chip_gen: v7x
topology: tpu7x:2x2x1
jax: 0.10.0
libtpu: 0.0.40
codegen_flags: <defaults>
</compile_context>

<pallas_src>
import functools

import jax
import jax.numpy as jnp
from jax import lax
from jax.experimental import pallas as pl
from jax.experimental.pallas import tpu as pltpu


# ----------------------------- kernel -----------------------------------------


def _dwconv_kernel(x_ref, wdw_ref, wpw_ref, bpw_ref, o_ref, *,
                   kh_sz, kw_sz, stride, th, w_out, c_in, c_out, mm_dtype):
    # x_ref  : (1, BH, Wp, Cin)  padded-input strip (BH >= (th-1)*stride + kh_sz)
    # wdw_ref: (KH, KW, Cin)     depthwise weights
    # wpw_ref: (Cin, Cout)       pointwise weights
    # bpw_ref: (1, Cout)         pointwise bias (depthwise bias already folded in, f32)
    # o_ref  : (1, th, Wout, Cout)
    x = x_ref[0]                                     # (BH, Wp, Cin), native dtype
    wdw = wdw_ref[...].astype(jnp.float32)           # (KH, KW, Cin)

    acc = jnp.zeros((th, w_out, c_in), jnp.float32)

    # Depthwise conv: hoist the W shift per kw (KW shifted views), reuse across the KH
    # (cheap leading-dim) row offsets. Cast per-view, accumulate in f32.
    for kw in range(kw_sz):
        if stride == 1:
            xw = x[:, kw:kw + w_out, :]              # (BH, Wout, Cin)
        else:
            xw = lax.slice(
                x, (0, kw, 0),
                (x.shape[0], kw + (w_out - 1) * stride + 1, c_in),
                (1, stride, 1))                       # (BH, Wout, Cin)
        xw = xw.astype(jnp.float32)
        for kh in range(kh_sz):
            if stride == 1:
                rows = xw[kh:kh + th, :, :]           # (th, Wout, Cin)
            else:
                rows = lax.slice(
                    xw, (kh, 0, 0),
                    (kh + (th - 1) * stride + 1, w_out, c_in),
                    (stride, 1, 1))                   # (th, Wout, Cin)
            acc = acc + rows * wdw[kh, kw, :][None, None, :]

    # Pointwise 1x1 conv == channel matmul on the MXU. Operands stay in the input dtype
    # (bf16 inputs -> bf16 MXU operands), accumulation in f32.
    y = jnp.dot(acc.reshape(th * w_out, c_in).astype(mm_dtype),
                wpw_ref[...].astype(mm_dtype),
                preferred_element_type=jnp.float32)
    y = y + bpw_ref[0][None, :].astype(jnp.float32)
    o_ref[0] = y.reshape(th, w_out, c_out).astype(o_ref.dtype)


# ----------------------------- wrapper helpers ---------------------------------


def _strip_vmem_bytes(th, stride, kh_sz, kw_sz, wp, w_out, c_in, c_out,
                      in_bytes, out_bytes):
    """Rough per-step VMEM footprint for a TH-row output strip (double-buffered I/O)."""
    in_h = (th - 1) * stride + kh_sz
    x_buf = 2 * in_h * wp * c_in * in_bytes                 # input strip, 2 buffers
    o_buf = 2 * th * w_out * c_out * out_bytes              # output strip, 2 buffers
    acc = th * w_out * c_in * 4                             # f32 accumulator
    tmp = in_h * w_out * c_in * 4 + th * w_out * c_out * 4  # shifted view + matmul result
    wgt = (kh_sz * kw_sz * c_in + c_in * c_out + c_out) * 8
    return x_buf + o_buf + 2 * (acc + tmp) + wgt


def _choose_th(h_out, stride, kh_sz, kw_sz, wp, w_out, c_in, c_out,
               in_bytes, out_bytes, budget_bytes=40 * 2**20):
    """Largest divisor of h_out whose strip fits the VMEM budget (falls back to 1)."""
    divisors = [d for d in range(h_out, 0, -1) if h_out % d == 0]
    for th in divisors:
        est = _strip_vmem_bytes(th, stride, kh_sz, kw_sz, wp, w_out,
                                c_in, c_out, in_bytes, out_bytes)
        if est <= budget_bytes:
            return th
    return divisors[-1]


# ----------------------------- public wrapper ----------------------------------


def dwconv2d(x_nchw, w_dw, b_dw, w_pw, b_pw, *, stride=1, padding=0):
    """DWConv2d forward.

    x_nchw : (B, Cin, H, W)
    w_dw   : (Cin, 1, KH, KW)   depthwise weight (PyTorch layout, groups=Cin)
    b_dw   : (Cin,)
    w_pw   : (Cout, Cin, 1, 1)  pointwise weight (PyTorch layout)
    b_pw   : (Cout,)
    returns: (B, Cout, Hout, Wout)
    """
    b, c_in, h, w = x_nchw.shape
    c_out = w_pw.shape[0]
    kh_sz, kw_sz = w_dw.shape[2], w_dw.shape[3]
    h_out = (h + 2 * padding - kh_sz) // stride + 1
    w_out = (w + 2 * padding - kw_sz) // stride + 1

    # Layout transforms + zero padding once in plain JAX (NCHW -> padded NHWC).
    x_nhwc = jnp.transpose(x_nchw, (0, 2, 3, 1))
    x_pad = jnp.pad(x_nhwc, ((0, 0), (padding, padding), (padding, padding), (0, 0)))
    hp, wp = x_pad.shape[1], x_pad.shape[2]

    wdw_k = jnp.transpose(w_dw[:, 0, :, :], (1, 2, 0))       # (KH, KW, Cin)
    wpw_k = jnp.transpose(w_pw[:, :, 0, 0], (1, 0))          # (Cin, Cout)
    # Fold depthwise bias into pointwise bias: (acc + b_dw) @ W + b_pw == acc @ W + (W.T b_dw + b_pw)
    bpw_eff = (b_pw.astype(jnp.float32)
               + w_pw[:, :, 0, 0].astype(jnp.float32) @ b_dw.astype(jnp.float32))
    bpw_k = bpw_eff.reshape(1, c_out)

    in_bytes = x_pad.dtype.itemsize
    out_bytes = jnp.dtype(x_nchw.dtype).itemsize
    th = _choose_th(h_out, stride, kh_sz, kw_sz, wp, w_out, c_in, c_out,
                    in_bytes, out_bytes)
    n_strips = h_out // th
    in_h_block = (th - 1) * stride + kh_sz

    if n_strips == 1:
        # Single strip: take the whole padded H, no halo handling needed.
        x_spec = pl.BlockSpec((1, hp, wp, c_in), lambda i, j: (i, 0, 0, 0))
    else:
        # Multi-strip: overlapping (halo) windows along H via element-offset indexing.
        x_spec = pl.BlockSpec(
            (1, pl.Element(in_h_block), wp, c_in),
            lambda i, j: (i, j * (th * stride), 0, 0))

    kernel = functools.partial(
        _dwconv_kernel,
        kh_sz=kh_sz, kw_sz=kw_sz, stride=stride, th=th,
        w_out=w_out, c_in=c_in, c_out=c_out, mm_dtype=x_pad.dtype,
    )

    est = _strip_vmem_bytes(th, stride, kh_sz, kw_sz, wp, w_out, c_in, c_out,
                            in_bytes, out_bytes)
    vmem_limit = int(max(32 * 2**20, min(64 * 2**20, 2 * est)))

    out_nhwc = pl.pallas_call(
        kernel,
        out_shape=jax.ShapeDtypeStruct((b, h_out, w_out, c_out), x_nchw.dtype),
        grid_spec=pltpu.PrefetchScalarGridSpec(
            num_scalar_prefetch=0,
            grid=(b, n_strips),
            in_specs=[
                x_spec,
                pl.BlockSpec((kh_sz, kw_sz, c_in), lambda i, j: (0, 0, 0)),
                pl.BlockSpec((c_in, c_out), lambda i, j: (0, 0)),
                pl.BlockSpec((1, c_out), lambda i, j: (0, 0)),
            ],
            out_specs=pl.BlockSpec((1, th, w_out, c_out), lambda i, j: (i, j, 0, 0)),
        ),
        compiler_params=pltpu.CompilerParams(
            dimension_semantics=("parallel", "parallel"),
            vmem_limit_bytes=vmem_limit),
    )(x_pad, wdw_k, wpw_k, bpw_k)

    return jnp.transpose(out_nhwc, (0, 3, 1, 2))  # back to NCHW


# ----------------------------- reference & demo ---------------------------------


def _reference(x_nchw, w_dw, b_dw, w_pw, b_pw, *, stride, padding):
    """Pure-JAX reference (lax conv) for validation."""
    c_in = x_nchw.shape[1]
    dn = lax.conv_dimension_numbers(x_nchw.shape, w_dw.shape, ("NCHW", "OIHW", "NCHW"))
    y = lax.conv_general_dilated(
        x_nchw, w_dw, window_strides=(stride, stride),
        padding=((padding, padding), (padding, padding)),
        dimension_numbers=dn, feature_group_count=c_in)
    y = y + b_dw.reshape(1, -1, 1, 1)
    dn2 = lax.conv_dimension_numbers(y.shape, w_pw.shape, ("NCHW", "OIHW", "NCHW"))
    z = lax.conv_general_dilated(y, w_pw, window_strides=(1, 1), padding="VALID",
                                 dimension_numbers=dn2)
    return z + b_pw.reshape(1, -1, 1, 1)


if __name__ == "__main__":
    # DWConv2d(in=4, out=8, kernel=3): stride=1/pad=1 and stride=2/pad=0 configurations.
    B, C_IN, C_OUT, H, W, K = 2, 4, 8, 16, 16, 3

    key = jax.random.PRNGKey(0)
    kx, k1, k2, k3, k4 = jax.random.split(key, 5)
    x = jax.random.normal(kx, (B, C_IN, H, W), dtype=jnp.float32)
    w_dw = jax.random.normal(k1, (C_IN, 1, K, K), dtype=jnp.float32) * 0.1
    b_dw = jax.random.normal(k2, (C_IN,), dtype=jnp.float32) * 0.1
    w_pw = jax.random.normal(k3, (C_OUT, C_IN, 1, 1), dtype=jnp.float32) * 0.1
    b_pw = jax.random.normal(k4, (C_OUT,), dtype=jnp.float32) * 0.1

    for stride, pad in ((1, 1), (2, 0)):
        out = dwconv2d(x, w_dw, b_dw, w_pw, b_pw, stride=stride, padding=pad)
        out = jax.block_until_ready(out)
        ref = _reference(x, w_dw, b_dw, w_pw, b_pw, stride=stride, padding=pad)
        assert out.shape == ref.shape, (out.shape, ref.shape)
        assert jnp.allclose(out, ref, atol=1e-4, rtol=1e-4), \
            f"mismatch vs reference (stride={stride}, pad={pad})"

    print("KERNEL_OK")
</pallas_src>

<mosaic_0001>
module attributes {stable_mosaic.version = 11 : i64} {
  func.func @_dwconv_kernel(%arg0: i32, %arg1: i32, %arg2: memref<1x18x18x4xf32, #tpu.memory_space<vmem>>, %arg3: memref<3x3x4xf32, #tpu.memory_space<vmem>>, %arg4: memref<4x8xf32, #tpu.memory_space<vmem>>, %arg5: memref<1x8xf32, #tpu.memory_space<vmem>>, %arg6: memref<1x16x16x8xf32, #tpu.memory_space<vmem>>) attributes {dimension_semantics = [#tpu.dimension_semantics<parallel>, #tpu.dimension_semantics<parallel>], iteration_bounds = array<i64: 2, 1>, scalar_prefetch = 0 : i64, scratch_operands = 0 : i64, tpu.core_type = #tpu.core_type<tc>, window_params = [{transform_indices = @transform_0, window_bounds = array<i64: 1, 18, 18, 4>}, {pipeline_mode = #tpu.pipeline_mode<synchronous>, transform_indices = @transform_1, window_bounds = array<i64: 3, 3, 4>}, {pipeline_mode = #tpu.pipeline_mode<synchronous>, transform_indices = @transform_2, window_bounds = array<i64: 4, 8>}, {pipeline_mode = #tpu.pipeline_mode<synchronous>, transform_indices = @transform_3, window_bounds = array<i64: 1, 8>}, {transform_indices = @transform_4, window_bounds = array<i64: 1, 16, 16, 8>}]} {
    %c0 = arith.constant 0 : index
    %c0_0 = arith.constant 0 : index
    %c0_1 = arith.constant 0 : index
    %c0_2 = arith.constant 0 : index
    %0 = vector.load %arg2[%c0, %c0_0, %c0_1, %c0_2] : memref<1x18x18x4xf32, #tpu.memory_space<vmem>>, vector<1x18x18x4xf32>
    %1 = vector.shape_cast %0 : vector<1x18x18x4xf32> to vector<18x18x4xf32>
    %c0_3 = arith.constant 0 : index
    %c0_4 = arith.constant 0 : index
    %c0_5 = arith.constant 0 : index
    %2 = vector.load %arg3[%c0_3, %c0_4, %c0_5] : memref<3x3x4xf32, #tpu.memory_space<vmem>>, vector<3x3x4xf32>
    %cst = arith.constant 0.000000e+00 : f32
    %3 = vector.broadcast %cst : f32 to vector<16x16x4xf32>
    %4 = vector.extract_strided_slice %1 {offsets = [0, 0, 0], sizes = [18, 16, 4], strides = [1, 1, 1]} : vector<18x18x4xf32> to vector<18x16x4xf32>
    %5 = vector.extract_strided_slice %4 {offsets = [0, 0, 0], sizes = [16, 16, 4], strides = [1, 1, 1]} : vector<18x16x4xf32> to vector<16x16x4xf32>
    %6 = vector.extract_strided_slice %2 {offsets = [0, 0, 0], sizes = [1, 1, 4], strides = [1, 1, 1]} : vector<3x3x4xf32> to vector<1x1x4xf32>
    %7 = vector.shape_cast %6 : vector<1x1x4xf32> to vector<4xf32>
    %8 = vector.shape_cast %7 : vector<4xf32> to vector<1x1x4xf32>
    %9 = vector.broadcast %8 : vector<1x1x4xf32> to vector<16x16x4xf32>
    %10 = arith.mulf %5, %9 : vector<16x16x4xf32>
    %11 = arith.addf %3, %10 : vector<16x16x4xf32>
    %12 = vector.extract_strided_slice %4 {offsets = [1, 0, 0], sizes = [16, 16, 4], strides = [1, 1, 1]} : vector<18x16x4xf32> to vector<16x16x4xf32>
    %13 = vector.extract_strided_slice %2 {offsets = [1, 0, 0], sizes = [1, 1, 4], strides = [1, 1, 1]} : vector<3x3x4xf32> to vector<1x1x4xf32>
    %14 = vector.shape_cast %13 : vector<1x1x4xf32> to vector<4xf32>
    %15 = vector.shape_cast %14 : vector<4xf32> to vector<1x1x4xf32>
    %16 = vector.broadcast %15 : vector<1x1x4xf32> to vector<16x16x4xf32>
    %17 = arith.mulf %12, %16 : vector<16x16x4xf32>
    %18 = arith.addf %11, %17 : vector<16x16x4xf32>
    %19 = vector.extract_strided_slice %4 {offsets = [2, 0, 0], sizes = [16, 16, 4], strides = [1, 1, 1]} : vector<18x16x4xf32> to vector<16x16x4xf32>
    %20 = vector.extract_strided_slice %2 {offsets = [2, 0, 0], sizes = [1, 1, 4], strides = [1, 1, 1]} : vector<3x3x4xf32> to vector<1x1x4xf32>
    %21 = vector.shape_cast %20 : vector<1x1x4xf32> to vector<4xf32>
    %22 = vector.shape_cast %21 : vector<4xf32> to vector<1x1x4xf32>
    %23 = vector.broadcast %22 : vector<1x1x4xf32> to vector<16x16x4xf32>
    %24 = arith.mulf %19, %23 : vector<16x16x4xf32>
    %25 = arith.addf %18, %24 : vector<16x16x4xf32>
    %26 = vector.extract_strided_slice %1 {offsets = [0, 1, 0], sizes = [18, 16, 4], strides = [1, 1, 1]} : vector<18x18x4xf32> to vector<18x16x4xf32>
    %27 = vector.extract_strided_slice %26 {offsets = [0, 0, 0], sizes = [16, 16, 4], strides = [1, 1, 1]} : vector<18x16x4xf32> to vector<16x16x4xf32>
    %28 = vector.extract_strided_slice %2 {offsets = [0, 1, 0], sizes = [1, 1, 4], strides = [1, 1, 1]} : vector<3x3x4xf32> to vector<1x1x4xf32>
    %29 = vector.shape_cast %28 : vector<1x1x4xf32> to vector<4xf32>
    %30 = vector.shape_cast %29 : vector<4xf32> to vector<1x1x4xf32>
    %31 = vector.broadcast %30 : vector<1x1x4xf32> to vector<16x16x4xf32>
    %32 = arith.mulf %27, %31 : vector<16x16x4xf32>
    %33 = arith.addf %25, %32 : vector<16x16x4xf32>
    %34 = vector.extract_strided_slice %26 {offsets = [1, 0, 0], sizes = [16, 16, 4], strides = [1, 1, 1]} : vector<18x16x4xf32> to vector<16x16x4xf32>
    %35 = vector.extract_strided_slice %2 {offsets = [1, 1, 0], sizes = [1, 1, 4], strides = [1, 1, 1]} : vector<3x3x4xf32> to vector<1x1x4xf32>
    %36 = vector.shape_cast %35 : vector<1x1x4xf32> to vector<4xf32>
    %37 = vector.shape_cast %36 : vector<4xf32> to vector<1x1x4xf32>
    %38 = vector.broadcast %37 : vector<1x1x4xf32> to vector<16x16x4xf32>
    %39 = arith.mulf %34, %38 : vector<16x16x4xf32>
    %40 = arith.addf %33, %39 : vector<16x16x4xf32>
    %41 = vector.extract_strided_slice %26 {offsets = [2, 0, 0], sizes = [16, 16, 4], strides = [1, 1, 1]} : vector<18x16x4xf32> to vector<16x16x4xf32>
    %42 = vector.extract_strided_slice %2 {offsets = [2, 1, 0], sizes = [1, 1, 4], strides = [1, 1, 1]} : vector<3x3x4xf32> to vector<1x1x4xf32>
    %43 = vector.shape_cast %42 : vector<1x1x4xf32> to vector<4xf32>
    %44 = vector.shape_cast %43 : vector<4xf32> to vector<1x1x4xf32>
    %45 = vector.broadcast %44 : vector<1x1x4xf32> to vector<16x16x4xf32>
    %46 = arith.mulf %41, %45 : vector<16x16x4xf32>
    %47 = arith.addf %40, %46 : vector<16x16x4xf32>
    %48 = vector.extract_strided_slice %1 {offsets = [0, 2, 0], sizes = [18, 16, 4], strides = [1, 1, 1]} : vector<18x18x4xf32> to vector<18x16x4xf32>
    %49 = vector.extract_strided_slice %48 {offsets = [0, 0, 0], sizes = [16, 16, 4], strides = [1, 1, 1]} : vector<18x16x4xf32> to vector<16x16x4xf32>
    %50 = vector.extract_strided_slice %2 {offsets = [0, 2, 0], sizes = [1, 1, 4], strides = [1, 1, 1]} : vector<3x3x4xf32> to vector<1x1x4xf32>
    %51 = vector.shape_cast %50 : vector<1x1x4xf32> to vector<4xf32>
    %52 = vector.shape_cast %51 : vector<4xf32> to vector<1x1x4xf32>
    %53 = vector.broadcast %52 : vector<1x1x4xf32> to vector<16x16x4xf32>
    %54 = arith.mulf %49, %53 : vector<16x16x4xf32>
    %55 = arith.addf %47, %54 : vector<16x16x4xf32>
    %56 = vector.extract_strided_slice %48 {offsets = [1, 0, 0], sizes = [16, 16, 4], strides = [1, 1, 1]} : vector<18x16x4xf32> to vector<16x16x4xf32>
    %57 = vector.extract_strided_slice %2 {offsets = [1, 2, 0], sizes = [1, 1, 4], strides = [1, 1, 1]} : vector<3x3x4xf32> to vector<1x1x4xf32>
    %58 = vector.shape_cast %57 : vector<1x1x4xf32> to vector<4xf32>
    %59 = vector.shape_cast %58 : vector<4xf32> to vector<1x1x4xf32>
    %60 = vector.broadcast %59 : vector<1x1x4xf32> to vector<16x16x4xf32>
    %61 = arith.mulf %56, %60 : vector<16x16x4xf32>
    %62 = arith.addf %55, %61 : vector<16x16x4xf32>
    %63 = vector.extract_strided_slice %48 {offsets = [2, 0, 0], sizes = [16, 16, 4], strides = [1, 1, 1]} : vector<18x16x4xf32> to vector<16x16x4xf32>
    %64 = vector.extract_strided_slice %2 {offsets = [2, 2, 0], sizes = [1, 1, 4], strides = [1, 1, 1]} : vector<3x3x4xf32> to vector<1x1x4xf32>
    %65 = vector.shape_cast %64 : vector<1x1x4xf32> to vector<4xf32>
    %66 = vector.shape_cast %65 : vector<4xf32> to vector<1x1x4xf32>
    %67 = vector.broadcast %66 : vector<1x1x4xf32> to vector<16x16x4xf32>
    %68 = arith.mulf %63, %67 : vector<16x16x4xf32>
    %69 = arith.addf %62, %68 : vector<16x16x4xf32>
    %70 = vector.shape_cast %69 : vector<16x16x4xf32> to vector<256x4xf32>
    %c0_6 = arith.constant 0 : index
    %c0_7 = arith.constant 0 : index
    %71 = vector.load %arg4[%c0_6, %c0_7] : memref<4x8xf32, #tpu.memory_space<vmem>>, vector<4x8xf32>
    %cst_8 = arith.constant dense<0.000000e+00> : vector<256x8xf32>
    %72 = tpu.matmul %70, %71, %cst_8 {dimension_numbers = #tpu.dot_dimension_numbers<[1], [0], [0], [1], [0, 0, 1, 1], [], []>} : vector<256x4xf32>, vector<4x8xf32>, vector<256x8xf32> -> vector<256x8xf32>
    %c0_9 = arith.constant 0 : index
    %c0_10 = arith.constant 0 : index
    %73 = vector.load %arg5[%c0_9, %c0_10] : memref<1x8xf32, #tpu.memory_space<vmem>>, vector<1x8xf32>
    %74 = vector.shape_cast %73 : vector<1x8xf32> to vector<8xf32>
    %75 = vector.shape_cast %74 : vector<8xf32> to vector<1x8xf32>
    %76 = vector.broadcast %75 : vector<1x8xf32> to vector<256x8xf32>
    %77 = arith.addf %72, %76 : vector<256x8xf32>
    %78 = vector.shape_cast %77 : vector<256x8xf32> to vector<16x16x8xf32>
    %c0_11 = arith.constant 0 : index
    %c0_12 = arith.constant 0 : index
    %c0_13 = arith.constant 0 : index
    %c0_14 = arith.constant 0 : index
    %79 = vector.load %arg6[%c0_11, %c0_12, %c0_13, %c0_14] : memref<1x16x16x8xf32, #tpu.memory_space<vmem>>, vector<1x16x16x8xf32>
    %80 = vector.shape_cast %79 : vector<1x16x16x8xf32> to vector<16x16x8xf32>
    %81 = vector.shape_cast %78 : vector<16x16x8xf32> to vector<1x16x16x8xf32>
    tpu.vector_store %arg6[%c0_11, %c0_12, %c0_13, %c0_14], %81 {strides = array<i32>} : memref<1x16x16x8xf32, #tpu.memory_space<vmem>>, vector<1x16x16x8xf32>,
    return
  }
  func.func @transform_0(%arg0: i32, %arg1: i32) -> (i32, i32, i32, i32) {
    %c0_i32 = arith.constant 0 : i32
    %c0_i32_0 = arith.constant 0 : i32
    %c0_i32_1 = arith.constant 0 : i32
    %c0_i32_2 = arith.constant 0 : i32
    return %arg0, %c0_i32, %c0_i32_0, %c0_i32_1 : i32, i32, i32, i32
  }
  func.func @transform_1(%arg0: i32, %arg1: i32) -> (i32, i32, i32) {
    %c0_i32 = arith.constant 0 : i32
    %c0_i32_0 = arith.constant 0 : i32
    %c0_i32_1 = arith.constant 0 : i32
    %c0_i32_2 = arith.constant 0 : i32
    return %c0_i32, %c0_i32_0, %c0_i32_1 : i32, i32, i32
  }
  func.func @transform_2(%arg0: i32, %arg1: i32) -> (i32, i32) {
    %c0_i32 = arith.constant 0 : i32
    %c0_i32_0 = arith.constant 0 : i32
    %c0_i32_1 = arith.constant 0 : i32
    return %c0_i32, %c0_i32_0 : i32, i32
  }
  func.func @transform_3(%arg0: i32, %arg1: i32) -> (i32, i32) {
    %c0_i32 = arith.constant 0 : i32
    %c0_i32_0 = arith.constant 0 : i32
    %c0_i32_1 = arith.constant 0 : i32
    return %c0_i32, %c0_i32_0 : i32, i32
  }
  func.func @transform_4(%arg0: i32, %arg1: i32) -> (i32, i32, i32, i32) {
    %c0_i32 = arith.constant 0 : i32
    %c0_i32_0 = arith.constant 0 : i32
    %c0_i32_1 = arith.constant 0 : i32
    return %arg0, %arg1, %c0_i32, %c0_i32_0 : i32, i32, i32, i32
  }
}

</mosaic_0001>

<bundles_post_ra>
// kernel: tpu_custom_call.1
= control target key start
LH: loop header
LB: loop body
LE: loop exit
PB: predicated region body
PF: predicated region fallthrough
CT: control target
= control target key end

     0   :  { %s2614_s15 = smov 0   ;;  %s2616_s16 = smov 0   ;;  %s4567_s0 = inlined_call_operand.vmem [shape: f32[2,18,18,4], index: 0, kind: input, shape index: {}]   ;;  %s4568_s1 = inlined_call_operand.vmem [shape: f32[3,3,4], index: 1, kind: input, shape index: {}]   ;;  %s4569_s2 = inlined_call_operand.vmem [shape: f32[4,8], index: 2, kind: input, shape index: {}]   ;;  %s4570_s3 = inlined_call_operand.vmem [shape: f32[1,8], index: 3, kind: input, shape index: {}]   ;;  %s4571_s4 = inlined_call_operand.vmem [shape: f32[2,16,16,8], index: 4, kind: output, shape index: {}]  }
   0x1   :  { %s2618_s17 = smov 0  }
   0x2 LB: > { %s26_s18 = sadd.s32 1, %s2583_s16  ;;  %p2408_p0 = scmp.ge.s32.totalorder %s2587_s17, 1  ;;  %s2587_s17 = sphi %s2618_s17, %s14_s17   ;;  %s2583_s16 = sphi %s2616_s16, %s4597_s16   ;;  %s2579_s15 = sphi %s2614_s15, %s4596_s15  }
   0x3   : > { %p28_p1 = scmp.ge.s32.totalorder %s26_s18, 2  ;;  %p176_p2 = scmp.lt.s32.totalorder %s2587_s17, 3 }
   0x5   : > { %s4599_s18 = smov (%p28_p1, %s26_s18), 0  ;;  %p177_p3 = pnand %p2408_p0, %p176_p2 }
   0x6   : > { %v1950_v0 = vld [vmem:[%s4569_s2] sm:$0xf] (!%p177_p3)  ;;  %vm2055_vm0 = vcmask (!%p177_p3), 1043456   ;;  %p207_p4 = scmp.lt.s32.totalorder (!%p177_p3), %s2579_s15, 1  ;;  %v280_v1 = vlaneseq (!%p177_p3)  ;;  %v278_v4 = vld [vmem:[%s4568_s1 + $0x4] sm:$0x7] (!%p177_p3) }
   0x7   : > { %180 = sbr.rel (%p177_p3) target bundleno = 527 (0x20f), region = 36  ;;  %2482 = vmatprep.subr.msk.mxu0 (!%p177_p3), %vm2055_vm0, %v1950_v0  ;;  %2532 = vmatprep.subr.msk.mxu1 (!%p177_p3), %vm2055_vm0, %v1950_v0  ;;  %v277_v3 = vld [vmem:[%s4568_s1] sm:$0x7] (!%p177_p3)  ;;  %v279_v5 = vld [vmem:[%s4568_s1 + $0x8] sm:$0x7] (!%p177_p3)  ;;  %vm584_vm1 = vcmask (!%p177_p3), 1046528  }
   0x8   : > { %2483 = vmatpush3.msk.msra.mxu0 (!%p177_p3), %vm2055_vm0, %v1950_v0  ;;  %2533 = vmatpush3.msk.msra.mxu1 (!%p177_p3), %vm2055_vm0, %v1950_v0  ;;  %v281_v2 = vshrl.u32 (!%p177_p3), %v280_v1, 7  ;;  %vm1317_vm2 = vcmask (!%p177_p3), 1045504   ;;  %vm1958_vm3 = vcmask (!%p177_p3), 31744   ;;  %vm2284_vm4 = vcmask (!%p177_p3), 64512  }
   0xa   : > { %v282_v6 = vsub.s32 (!%p177_p3), 0, %v281_v2  ;;  %v486_v7 = vsub.s32 (!%p177_p3), 1, %v281_v2  ;;  %v1219_v8 = vsub.s32 (!%p177_p3), 2, %v281_v2 }
   0xc   : > { %v2652_v9 = vrot.slane (!%p177_p3), %v277_v3, %v282_v6  ;;  %v2654_v10 = vrot.slane (!%p177_p3), %v278_v4, %v282_v6  ;;  %v2656_v11 = vrot.slane (!%p177_p3), %v279_v5, %v282_v6  ;;  %v2658_v12 = vrot.slane (!%p177_p3), %v277_v3, %v486_v7 }
   0xd   : > { %v2665_v16 = vrot.slane (!%p177_p3), %v278_v4, %v486_v7  ;;  %v2667_v17 = vrot.slane (!%p177_p3), %v279_v5, %v486_v7  ;;  %v2669_v18 = vrot.slane (!%p177_p3), %v277_v3, %v1219_v8  ;;  %v2671_v19 = vrot.slane (!%p177_p3), %v278_v4, %v1219_v8 }
   0xe   : > { %s4601_s15 = smov (!%p207_p4, %s2579_s15), 1  ;;  %v2738_v57 = vrot.slane %v279_v5, %v1219_v8 }
   0xf   : > { %s2534_s27 = smul.u32 432, %s4601_s15  ;;  %s2448_s5 = sshll.u32 %s4601_s15, 8 }
  0x10   : > { %s4442_s10 = scalar_lea.vmem %s4571_s4, %s2448_s5 }
  0x11   : > { %s2650_s30 = scalar_lea.vmem %s4567_s0, %s2534_s27 }
  0x12   : > { %v223_v13 = vld [vmem:[%s2650_s30] sm:$0xff]  ;;  %v224_v14 = vld [vmem:[%s2650_s30 + $0x8] sm:$0xff]  ;;  %v2663_v15 = vld [vmem:[%s2650_s30 + $0x18] sm:$0xff] }
  0x13   : > { %v2674_v20 = vld [vmem:[%s2650_s30 + $0x20] sm:$0xff]  ;;  %v2677_v21 = vld [vmem:[%s2650_s30 + $0x30] sm:$0xff]  ;;  %v284_v22 = vmul.f32 %v2652_v9, %v223_v13  ;;  %v285_v23 = vmul.f32 %v2652_v9, %v224_v14  ;;  %v352_v24 = vmul.f32 %v2654_v10, %v2663_v15  ;;  %v488_v25 = vmul.f32 %v2658_v12, %v223_v13  ;;  %v2694_v30 = vld [vmem:[%s2650_s30 + $0x38] sm:$0xff] }
  0x14   : > { %v353_v26 = vmul.f32 %v2654_v10, %v2674_v20  ;;  %v420_v27 = vmul.f32 %v2656_v11, %v2677_v21  ;;  %v2689_v28 = vmul.f32 %v2658_v12, %v224_v14  ;;  %v733_v29 = vmul.f32 %v2665_v16, %v2663_v15  ;;  %v247_v47 = vld [vmem:[%s2650_s30 + $0xc0] sm:$0xff]  ;;  %v2722_v48 = vld [vmem:[%s2650_s30 + $0xd8] sm:$0xff]  ;;  %v2732_v53 = vld [vmem:[%s2650_s30 + $0xf0] sm:$0xff] }
  0x15   : > { %v384_v31 = vadd.f32 %v352_v24, %v284_v22  ;;  %v585_v32 = vrot.slane %v488_v25, 1  ;;  %v2698_v33 = vmul.f32 %v2665_v16, %v2674_v20  ;;  %v977_v34 = vmul.f32 %v2667_v17, %v2677_v21  ;;  %v2742_v60 = vld [vmem:[%s2650_s30 + $0xc8] sm:$0xff] }
  0x16   : > { %v2702_v35 = vadd.f32 %v353_v26, %v285_v23  ;;  %v586_v36 = vrot.slane %v2689_v28, 1  ;;  %v829_v37 = vrot.slane %v733_v29, 1  ;;  %v2707_v38 = vmul.f32 %v2667_v17, %v2694_v30  ;;  %v2780_v29 = vld [vmem:[%s2650_s30 + $0xf8] sm:$0xff] }
  0x17   : > { %v452_v39 = vadd.f32 %v420_v27, %v384_v31  ;;  %v830_v40 = vrot.slane %v2698_v33, 1  ;;  %v1073_v41 = vrot.slane %v977_v34, 1  ;;  %v1221_v42 = vmul.f32 %v2669_v18, %v223_v13  ;;  %v2764_v13 = vld [vmem:[%s2650_s30 + $0xe0] sm:$0xff] }
  0x18   : > { %v587_v43 = vsel %vm584_vm1, %v585_v32, %v586_v36  ;;  %v1074_v44 = vrot.slane %v2707_v38, 1  ;;  %v2716_v45 = vmul.f32 %v2669_v18, %v224_v14  ;;  %v1466_v46 = vmul.f32 %v2671_v19, %v2663_v15 }
  0x19   : > { %v697_v49 = vadd.f32 %v587_v43, %v452_v39  ;;  %v831_v50 = vsel %vm584_vm1, %v829_v37, %v830_v40  ;;  %v1318_v51 = vrot.slane %v1221_v42, 2  ;;  %v2729_v52 = vmul.f32 %v2671_v19, %v2674_v20 }
  0x1a   : > { %v1075_v54 = vsel %vm584_vm1, %v1073_v41, %v1074_v44  ;;  %v1319_v55 = vrot.slane %v2716_v45, 2  ;;  %v1562_v56 = vrot.slane %v1466_v46, 2  ;;  %v300_v61 = vmul.f32 %v2652_v9, %v247_v47 }
  0x1b   : > { %v941_v58 = vadd.f32 %v831_v50, %v697_v49  ;;  %v1563_v59 = vrot.slane %v2729_v52, 2  ;;  %v368_v62 = vmul.f32 %v2654_v10, %v2722_v48  ;;  %v1710_v0 = vmul.f32 %v2738_v57, %v2677_v21 }
  0x1c   : > { %v1320_v63 = vsel %vm1317_vm2, %v1318_v51, %v1319_v55  ;;  %v2754_v1 = vmul.f32 %v2738_v57, %v2694_v30  ;;  %v436_v2 = vmul.f32 %v2656_v11, %v2732_v53  ;;  %v512_v6 = vmul.f32 %v2658_v12, %v247_v47 }
  0x1d   : > { %v1185_v3 = vadd.f32 %v1075_v54, %v941_v58  ;;  %v1564_v4 = vsel %vm1317_vm2, %v1562_v56, %v1563_v59  ;;  %v400_v5 = vadd.f32 %v368_v62, %v300_v61  ;;  %v1806_v7 = vrot.slane %v1710_v0, 2  ;;  %v225_v58 = vld [vmem:[%s2650_s30 + $0x10] sm:$0x3] }
  0x1e   : > { %v1807_v8 = vrot.slane %v2754_v1, 2  ;;  %v2768_v14 = vmul.f32 %v2658_v12, %v2742_v60  ;;  %v757_v22 = vmul.f32 %v2665_v16, %v2722_v48  ;;  %v625_v25 = vrot.slane %v512_v6, 1 }
  0x1f   : > { %v1430_v23 = vadd.f32 %v1320_v63, %v1185_v3  ;;  %v468_v24 = vadd.f32 %v436_v2, %v400_v5  ;;  %v2774_v26 = vmul.f32 %v2665_v16, %v2764_v13  ;;  %v1001_v34 = vmul.f32 %v2667_v17, %v2732_v53  ;;  %v2811_v2 = vld [vmem:[%s2650_s30 + $0x28] sm:$0x3] }
  0x20   : > { %v1808_v27 = vsel %vm1317_vm2, %v1806_v7, %v1807_v8  ;;  %v626_v31 = vrot.slane %v2768_v14, 1  ;;  %v869_v32 = vrot.slane %v757_v22, 1  ;;  %v2788_v41 = vmul.f32 %v2667_v17, %v2780_v29  ;;  %v2824_v7 = vld [vmem:[%s2650_s30 + $0x40] sm:$0x3] }
  0x21   : > { %v1674_v37 = vadd.f32 %v1564_v4, %v1430_v23  ;;  %v870_v39 = vrot.slane %v2774_v26, 1  ;;  %v1245_v42 = vmul.f32 %v2669_v18, %v247_v47  ;;  %v1113_v46 = vrot.slane %v1001_v34, 1 }
  0x22   : > { %v627_v43 = vsel %vm584_vm1, %v625_v25, %v626_v31  ;;  %v2796_v49 = vmul.f32 %v2669_v18, %v2742_v60  ;;  %v1490_v50 = vmul.f32 %v2671_v19, %v2722_v48  ;;  %v1114_v47 = vrot.slane %v2788_v41, 1  ;;  %v2912_v41 = vld [vmem:[%s2650_s30 + $0x50] sm:$0xff] }
  0x23   : > { %v1918_v51 = vadd.f32 %v1808_v27, %v1674_v37  ;;  %v713_v54 = vadd.f32 %v627_v43, %v468_v24  ;;  %v871_v56 = vsel %vm584_vm1, %v869_v32, %v870_v39  ;;  %v1358_v61 = vrot.slane %v1245_v42, 2 }
  0x24   : > { %v1359_v62 = vrot.slane %v2796_v49, 2  ;;  %v2808_v63 = vmul.f32 %v2671_v19, %v2764_v13  ;;  %v1602_v0 = vrot.slane %v1490_v50, 2  ;;  %v1115_v4 = vsel %vm584_vm1, %v1113_v46, %v1114_v47 }
  0x25   : > { %2484 = vmatprep.mubr.msk.f32.mxu0 %vm1958_vm3, %v1918_v51  ;;  %v957_v3 = vadd.f32 %v871_v56, %v713_v54  ;;  %v1734_v5 = vmul.f32 %v2738_v57, %v2732_v53  ;;  %v2821_v6 = vmul.f32 %v2738_v57, %v2780_v29  ;;  %v421_v24 = vmul.f32 %v2656_v11, %v2694_v30 }
  0x26   : > { %v1360_v22 = vsel %vm1317_vm2, %v1358_v61, %v1359_v62  ;;  %v1603_v23 = vrot.slane %v2808_v63, 2  ;;  %v490_v25 = vmul.f32 %v2658_v12, %v225_v58  ;;  %v735_v37 = vmul.f32 %v2665_v16, %v2811_v2 }
  0x27   : > { %v1201_v27 = vadd.f32 %v1115_v4, %v957_v3  ;;  %v1846_v32 = vrot.slane %v1734_v5, 2  ;;  %v1847_v34 = vrot.slane %v2821_v6, 2  ;;  %v453_v43 = vadd.f32 %v421_v24, %v2702_v35  ;;  %v249_v24 = vld [vmem:[%s2650_s30 + $0xd0] sm:$0x3] }
  0x28   : > { %v1604_v42 = vsel %vm1317_vm2, %v1602_v0, %v1603_v23  ;;  %v588_v46 = vrot.slane %v490_v25, 1  ;;  %v979_v50 = vmul.f32 %v2667_v17, %v2824_v7  ;;  %v832_v56 = vrot.slane %v735_v37, 1  ;;  %v2857_v25 = vld [vmem:[%s2650_s30 + $0xe8] sm:$0x3] }
  0x29   : > { %v1446_v51 = vadd.f32 %v1360_v22, %v1201_v27  ;;  %v1848_v54 = vsel %vm1317_vm2, %v1846_v32, %v1847_v34  ;;  %v1223_v61 = vmul.f32 %v2669_v18, %v225_v58  ;;  %v1468_v35 = vmul.f32 %v2671_v19, %v2811_v2  ;;  %v2860_v27 = vld [vmem:[%s2650_s30 + $0x100] sm:$0x3] }
  0x2a   : > { %v589_v63 = vsel %vm584_vm1, %v586_v36, %v588_v46  ;;  %v1076_v0 = vrot.slane %v979_v50, 1  ;;  %v1712_v3 = vmul.f32 %v2738_v57, %v2824_v7  ;;  %v833_v6 = vsel %vm584_vm1, %v830_v40, %v832_v56 }
  0x2b   : > { %v1690_v4 = vadd.f32 %v1604_v42, %v1446_v51  ;;  %v698_v5 = vadd.f32 %v589_v63, %v453_v43  ;;  %v1321_v22 = vrot.slane %v1223_v61, 2  ;;  %v1565_v36 = vrot.slane %v1468_v35, 2 }
  0x2c   : > { %v1077_v28 = vsel %vm584_vm1, %v1074_v44, %v1076_v0  ;;  %v1809_v58 = vrot.slane %v1712_v3, 2  ;;  %v301_v32 = vmul.f32 %v2652_v9, %v2742_v60  ;;  %v369_v38 = vmul.f32 %v2654_v10, %v2764_v13 }
  0x2d   : > { %v1934_v37 = vadd.f32 %v1848_v54, %v1690_v4  ;;  %v942_v42 = vadd.f32 %v833_v6, %v698_v5  ;;  %v1322_v33 = vsel %vm1317_vm2, %v1319_v55, %v1321_v22  ;;  %v1566_v40 = vsel %vm1317_vm2, %v1563_v59, %v1565_v36  ;;  %v2892_v4 = vld [vmem:[%s2650_s30 + $0x48] sm:$0xff] }
  0x2e   : > { %v1810_v44 = vsel %vm1317_vm2, %v1807_v8, %v1809_v58  ;;  %v437_v60 = vmul.f32 %v2656_v11, %v2780_v29  ;;  %v514_v43 = vmul.f32 %v2658_v12, %v249_v24  ;;  %v401_v55 = vadd.f32 %v369_v38, %v301_v32 }
  0x2f   : > { %2508 = vmatprep.mubr.msk.f32.mxu1 %vm1958_vm3, %v1934_v37  ;;  %v1186_v45 = vadd.f32 %v1077_v28, %v942_v42  ;;  %v759_v46 = vmul.f32 %v2665_v16, %v2857_v25  ;;  %v1003_v52 = vmul.f32 %v2667_v17, %v2860_v27  ;;  %v1247_v1 = vmul.f32 %v2669_v18, %v249_v24 }
  0x30   : > { %v628_v59 = vrot.slane %v514_v43, 1  ;;  %v1492_v8 = vmul.f32 %v2671_v19, %v2857_v25  ;;  %v1736_v50 = vmul.f32 %v2738_v57, %v2860_v27  ;;  %v469_v54 = vadd.f32 %v437_v60, %v401_v55 }
  0x31   : > { %v1431_v51 = vadd.f32 %v1322_v33, %v1186_v45  ;;  %v872_v56 = vrot.slane %v759_v46, 1  ;;  %v1116_v61 = vrot.slane %v1003_v52, 1  ;;  %v1361_v0 = vrot.slane %v1247_v1, 2 }
  0x32   : > { %v629_v63 = vsel %vm584_vm1, %v626_v31, %v628_v59  ;;  %v1605_v35 = vrot.slane %v1492_v8, 2  ;;  %v1849_v3 = vrot.slane %v1736_v50, 2  ;;  %v286_v36 = vmul.f32 %v2652_v9, %v2663_v15 }
  0x33   : > { %v1675_v5 = vadd.f32 %v1566_v40, %v1431_v51  ;;  %v714_v6 = vadd.f32 %v629_v63, %v469_v54  ;;  %v873_v22 = vsel %vm584_vm1, %v870_v39, %v872_v56  ;;  %v1117_v24 = vsel %vm584_vm1, %v1114_v47, %v1116_v61 }
  0x34   : > { %v1362_v14 = vsel %vm1317_vm2, %v1359_v62, %v1361_v0  ;;  %v1606_v31 = vsel %vm1317_vm2, %v1603_v23, %v1605_v35  ;;  %v1850_v28 = vsel %vm1317_vm2, %v1847_v34, %v1849_v3  ;;  %v354_v26 = vmul.f32 %v2654_v10, %v2677_v21  ;;  %v2961_v35 = vld [vmem:[%s2650_s30 + $0x108] sm:$0xff] }
  0x35   : > { %v1919_v58 = vadd.f32 %v1810_v44, %v1675_v5  ;;  %v958_v32 = vadd.f32 %v873_v22, %v714_v6  ;;  %v422_v39 = vmul.f32 %v2656_v11, %v2892_v4  ;;  %v491_v49 = vmul.f32 %v2658_v12, %v2663_v15 }
  0x36   : > { %v2918_v47 = vmul.f32 %v2658_v12, %v2674_v20  ;;  %v736_v62 = vmul.f32 %v2665_v16, %v2677_v21  ;;  %v2924_v23 = vmul.f32 %v2665_v16, %v2694_v30  ;;  %v386_v37 = vadd.f32 %v354_v26, %v286_v36 }
  0x37   : > { %2485 = vmatmul.mubr.msk.f32.vlgmr.msra.gmra.mrb[0].mxu0 %vm1958_vm3, %v1919_v58  ;;  %v1202_v34 = vadd.f32 %v1117_v24, %v958_v32  ;;  %v980_v42 = vmul.f32 %v2667_v17, %v2892_v4  ;;  %v2931_v33 = vmul.f32 %v2667_v17, %v2912_v41  ;;  %v590_v38 = vrot.slane %v491_v49, 1 }
  0x38   : > { %v591_v40 = vrot.slane %v2918_v47, 1  ;;  %v834_v44 = vrot.slane %v736_v62, 1  ;;  %v835_v60 = vrot.slane %v2924_v23, 1  ;;  %v454_v45 = vadd.f32 %v422_v39, %v386_v37 }
  0x39   : > { %v1447_v43 = vadd.f32 %v1362_v14, %v1202_v34  ;;  %v1078_v55 = vrot.slane %v980_v42, 1  ;;  %v1079_v46 = vrot.slane %v2931_v33, 1  ;;  %v1224_v1 = vmul.f32 %v2669_v18, %v2663_v15 }
  0x3a   : > { %v592_v52 = vsel %vm584_vm1, %v590_v38, %v591_v40  ;;  %v836_v59 = vsel %vm584_vm1, %v834_v44, %v835_v60  ;;  %v2946_v8 = vmul.f32 %v2669_v18, %v2674_v20  ;;  %v1469_v56 = vmul.f32 %v2671_v19, %v2677_v21 }
  0x3b   : > { %v1691_v50 = vadd.f32 %v1606_v31, %v1447_v43  ;;  %v699_v51 = vadd.f32 %v592_v52, %v454_v45  ;;  %v1080_v54 = vsel %vm584_vm1, %v1078_v55, %v1079_v46  ;;  %v1323_v61 = vrot.slane %v1224_v1, 2  ;;  %v2998_v43 = vld [vmem:[%s2650_s30 + $0x110] sm:$0xff] }
  0x3c   : > { %v1324_v63 = vrot.slane %v2946_v8, 2  ;;  %v2956_v0 = vmul.f32 %v2671_v19, %v2694_v30  ;;  %v1713_v15 = vmul.f32 %v2738_v57, %v2892_v4  ;;  %v1567_v6 = vrot.slane %v1469_v56, 2 }
  0x3d   : > { %v1935_v3 = vadd.f32 %v1850_v28, %v1691_v50  ;;  %v943_v5 = vadd.f32 %v836_v59, %v699_v51  ;;  %v2965_v22 = vmul.f32 %v2738_v57, %v2912_v41  ;;  %v302_v36 = vmul.f32 %v2652_v9, %v2722_v48 }
  0x3e   : > { %v1325_v24 = vsel %vm1317_vm2, %v1323_v61, %v1324_v63  ;;  %v1568_v14 = vrot.slane %v2956_v0, 2  ;;  %v1811_v31 = vrot.slane %v1713_v15, 2  ;;  %v370_v32 = vmul.f32 %v2654_v10, %v2732_v53 }
  0x3f   : > { %2509 = vmatmul.mubr.msk.f32.vlgmr.msra.gmra.mrb[0].mxu1 %vm1958_vm3, %v1935_v3  ;;  %v1187_v28 = vadd.f32 %v1080_v54, %v943_v5  ;;  %v1812_v58 = vrot.slane %v2965_v22, 2  ;;  %v438_v26 = vmul.f32 %v2656_v11, %v2961_v35  ;;  %v515_v49 = vmul.f32 %v2658_v12, %v2722_v48 }
  0x40   : > { %v1569_v39 = vsel %vm1317_vm2, %v1567_v6, %v1568_v14  ;;  %v2986_v62 = vmul.f32 %v2658_v12, %v2764_v13  ;;  %v760_v34 = vmul.f32 %v2665_v16, %v2732_v53  ;;  %v402_v38 = vadd.f32 %v370_v32, %v302_v36 }
  0x41   : > { %v1432_v37 = vadd.f32 %v1325_v24, %v1187_v28  ;;  %v1813_v42 = vsel %vm1317_vm2, %v1811_v31, %v1812_v58  ;;  %v2995_v44 = vmul.f32 %v2665_v16, %v2780_v29  ;;  %v630_v45 = vrot.slane %v515_v49, 1 }
  0x42   : > { %v631_v55 = vrot.slane %v2986_v62, 1  ;;  %v874_v52 = vrot.slane %v760_v34, 1  ;;  %v1004_v59 = vmul.f32 %v2667_v17, %v2961_v35  ;;  %v470_v50 = vadd.f32 %v438_v26, %v402_v38 }
  0x43   : > { %v1676_v1 = vadd.f32 %v1569_v39, %v1432_v37  ;;  %v875_v51 = vrot.slane %v2995_v44, 1  ;;  %v3006_v54 = vmul.f32 %v2667_v17, %v2998_v43  ;;  %v1248_v15 = vmul.f32 %v2669_v18, %v2722_v48 }
  0x44   : > { %v632_v56 = vsel %vm584_vm1, %v630_v45, %v631_v55  ;;  %v1118_v61 = vrot.slane %v1004_v59, 1  ;;  %v3015_v3 = vmul.f32 %v2669_v18, %v2764_v13  ;;  %v1493_v32 = vmul.f32 %v2671_v19, %v2732_v53  ;;  %v3043_v45 = vld [vmem:[%s2650_s30 + $0x58] sm:$0x3] }
  0x45   : > { %v1920_v5 = vadd.f32 %v1813_v42, %v1676_v1  ;;  %v715_v6 = vadd.f32 %v632_v56, %v470_v50  ;;  %v876_v24 = vsel %vm584_vm1, %v874_v52, %v875_v51  ;;  %v1119_v31 = vrot.slane %v3006_v54, 1 }
  0x46   : > { %v1363_v36 = vrot.slane %v1248_v15, 2  ;;  %v4573_v28 = vrot.slane %v3015_v3, 2  ;;  %v3026_v48 = vmul.f32 %v2671_v19, %v2780_v29  ;;  %v1737_v49 = vmul.f32 %v2738_v57, %v2961_v35 }
  0x47   : > { %2487 = vmatprep.mubr.msk.f32.mxu0 %vm1958_vm3, %v1920_v5  ;;  %v959_v26 = vadd.f32 %v876_v24, %v715_v6  ;;  %v1120_v39 = vsel %vm584_vm1, %v1118_v61, %v1119_v31  ;;  %v3036_v34 = vmul.f32 %v2738_v57, %v2998_v43  ;;  %v1607_v42 = vrot.slane %v1493_v32, 2 }
  0x48   : > { %v1365_v37 = vsel %vm1317_vm2, %v1363_v36, %v4573_v28  ;;  %v4572_v38 = vrot.slane %v3026_v48, 2  ;;  %v287_v52 = vmul.f32 %v2652_v9, %v2674_v20  ;;  %v1851_v1 = vrot.slane %v1737_v49, 2 }
  0x49   : > { %v1203_v59 = vadd.f32 %v1120_v39, %v959_v26  ;;  %v1852_v50 = vrot.slane %v3036_v34, 2  ;;  %v355_v56 = vmul.f32 %v2654_v10, %v2694_v30  ;;  %v423_v15 = vmul.f32 %v2656_v11, %v2912_v41 }
  0x4a   : > { %v1609_v61 = vsel %vm1317_vm2, %v1607_v42, %v4572_v38  ;;  %v493_v5 = vmul.f32 %v2658_v12, %v2811_v2  ;;  %v738_v20 = vmul.f32 %v2665_v16, %v2824_v7  ;;  %v982_v32 = vmul.f32 %v2667_v17, %v3043_v45 }
  0x4b   : > { %v1448_v6 = vadd.f32 %v1365_v37, %v1203_v59  ;;  %v1853_v24 = vsel %vm1317_vm2, %v1851_v1, %v1852_v50  ;;  %v387_v36 = vadd.f32 %v355_v56, %v287_v52  ;;  %v1226_v49 = vmul.f32 %v2669_v18, %v2811_v2 }
  0x4c   : > { %v593_v26 = vrot.slane %v493_v5, 1  ;;  %v837_v39 = vrot.slane %v738_v20, 1  ;;  %v1471_v34 = vmul.f32 %v2671_v19, %v2824_v7  ;;  %v1081_v28 = vrot.slane %v982_v32, 1  ;;  %v3078_v20 = vld [vmem:[%s2650_s30 + $0x118] sm:$0x3] }
  0x4d   : > { %v1692_v42 = vadd.f32 %v1609_v61, %v1448_v6  ;;  %v455_v38 = vadd.f32 %v423_v15, %v387_v36  ;;  %v1715_v37 = vmul.f32 %v2738_v57, %v3043_v45  ;;  %v1326_v1 = vrot.slane %v1226_v49, 2 }
  0x4e   : > { %v594_v52 = vsel %vm584_vm1, %v591_v40, %v593_v26  ;;  %v838_v59 = vsel %vm584_vm1, %v835_v60, %v837_v39  ;;  %v1570_v56 = vrot.slane %v1471_v34, 2  ;;  %v1082_v61 = vsel %vm584_vm1, %v1079_v46, %v1081_v28 }
  0x4f   : > { %v1936_v2 = vadd.f32 %v1853_v24, %v1692_v42  ;;  %v700_v5 = vadd.f32 %v594_v52, %v455_v38  ;;  %v1814_v15 = vrot.slane %v1715_v37, 2  ;;  %v1327_v47 = vsel %vm1317_vm2, %v1324_v63, %v1326_v1 }
  0x50   : > { %v1571_v23 = vsel %vm1317_vm2, %v1568_v14, %v1570_v56  ;;  %v303_v40 = vmul.f32 %v2652_v9, %v2764_v13  ;;  %v371_v60 = vmul.f32 %v2654_v10, %v2780_v29  ;;  %v439_v8 = vmul.f32 %v2656_v11, %v2998_v43 }
  0x51   : > { %2511 = vmatprep.mubr.msk.f32.mxu1 %vm1958_vm3, %v1936_v2  ;;  %v944_v33 = vadd.f32 %v838_v59, %v700_v5  ;;  %v1815_v46 = vsel %vm1317_vm2, %v1812_v58, %v1814_v15  ;;  %v517_v63 = vmul.f32 %v2658_v12, %v2857_v25  ;;  %v762_v13 = vmul.f32 %v2665_v16, %v2860_v27 }
  0x52   : > { %v403_v0 = vadd.f32 %v371_v60, %v303_v40  ;;  %v1006_v14 = vmul.f32 %v2667_v17, %v3078_v20  ;;  %v1250_v28 = vmul.f32 %v2669_v18, %v2857_v25  ;;  %v1495_v58 = vmul.f32 %v2671_v19, %v2860_v27  ;;  %v3112_v25 = vld [vmem:[%s2650_s30 + $0x60] sm:$0xff] }
  0x53   : > { %v1188_v22 = vadd.f32 %v1082_v61, %v944_v33  ;;  %v633_v38 = vrot.slane %v517_v63, 1  ;;  %v1739_v6 = vmul.f32 %v2738_v57, %v3078_v20  ;;  %v877_v36 = vrot.slane %v762_v13, 1 }
  0x54   : > { %v471_v24 = vadd.f32 %v439_v8, %v403_v0  ;;  %v1121_v32 = vrot.slane %v1006_v14, 1  ;;  %v1366_v26 = vrot.slane %v1250_v28, 2  ;;  %v1610_v34 = vrot.slane %v1495_v58, 2 }
  0x55   : > { %v1433_v39 = vadd.f32 %v1327_v47, %v1188_v22  ;;  %v634_v49 = vsel %vm584_vm1, %v631_v55, %v633_v38  ;;  %v1854_v42 = vrot.slane %v1739_v6, 2  ;;  %v878_v52 = vsel %vm584_vm1, %v875_v51, %v877_v36 }
  0x56   : > { %v716_v37 = vadd.f32 %v634_v49, %v471_v24  ;;  %v1122_v59 = vsel %vm584_vm1, %v1119_v31, %v1121_v32  ;;  %v4584_v1 = vrot.slane %v3015_v3, 2  ;;  %v4585_v55 = vrot.slane %v3026_v48, 2 }
  0x57   : > { %v1677_v56 = vadd.f32 %v1571_v23, %v1433_v39  ;;  %v1855_v5 = vsel %vm1317_vm2, %v1852_v50, %v1854_v42  ;;  %v288_v44 = vmul.f32 %v2652_v9, %v2677_v21  ;;  %v356_v54 = vmul.f32 %v2654_v10, %v2892_v4  ;;  %v3146_v23 = vld [vmem:[%s2650_s30 + $0x68] sm:$0xff] }
  0x58   : > { %v1367_v62 = vsel %vm1317_vm2, %v4584_v1, %v1366_v26  ;;  %v1611_v2 = vsel %vm1317_vm2, %v4585_v55, %v1610_v34  ;;  %v960_v51 = vadd.f32 %v878_v52, %v716_v37  ;;  %v424_v31 = vmul.f32 %v2656_v11, %v3112_v25  ;;  %v3183_v37 = vld [vmem:[%s2650_s30 + $0x120] sm:$0xff] }
  0x59   : > { %v494_v3 = vmul.f32 %v2658_v12, %v2677_v21  ;;  %v1921_v61 = vadd.f32 %v1815_v46, %v1677_v56  ;;  %v3137_v48 = vmul.f32 %v2658_v12, %v2694_v30  ;;  %v739_v50 = vmul.f32 %v2665_v16, %v2892_v4 }
  0x5a   : > { %v3143_v15 = vmul.f32 %v2665_v16, %v2912_v41  ;;  %v1204_v47 = vadd.f32 %v1122_v59, %v960_v51  ;;  %v388_v40 = vadd.f32 %v356_v54, %v288_v44  ;;  %v983_v33 = vmul.f32 %v2667_v17, %v3112_v25 }
  0x5b   : > { %v595_v60 = vrot.slane %v494_v3, 1  ;;  %2488 = vmatmul.mubr.msk.f32.gmra.mrb[2].mxu0 %vm1958_vm3, %v1921_v61  ;;  %v596_v46 = vrot.slane %v3137_v48, 1  ;;  %v839_v8 = vrot.slane %v739_v50, 1  ;;  %v3155_v0 = vmul.f32 %v2667_v17, %v3146_v23 }
  0x5c   : > { %v840_v63 = vrot.slane %v3143_v15, 1  ;;  %v1449_v13 = vadd.f32 %v1367_v62, %v1204_v47  ;;  %v456_v14 = vadd.f32 %v424_v31, %v388_v40  ;;  %v1083_v28 = vrot.slane %v983_v33, 1 }
  0x5d   : > { %v1227_v22 = vmul.f32 %v2669_v18, %v2677_v21  ;;  %v597_v38 = vsel %vm584_vm1, %v595_v60, %v596_v46  ;;  %v1084_v6 = vrot.slane %v3155_v0, 1  ;;  %v3168_v24 = vmul.f32 %v2669_v18, %v2694_v30 }
  0x5e   : > { %v841_v58 = vsel %vm584_vm1, %v839_v8, %v840_v63  ;;  %v1693_v36 = vadd.f32 %v1611_v2, %v1449_v13  ;;  %v701_v32 = vadd.f32 %v597_v38, %v456_v14  ;;  %v1472_v21 = vmul.f32 %v2671_v19, %v2892_v4  ;;  %v3220_v13 = vld [vmem:[%s2650_s30 + $0x128] sm:$0xff] }
  0x5f   : > { %v1328_v26 = vrot.slane %v1227_v22, 2  ;;  %v1085_v39 = vsel %vm584_vm1, %v1083_v28, %v1084_v6  ;;  %v1329_v49 = vrot.slane %v3168_v24, 2  ;;  %v3178_v34 = vmul.f32 %v2671_v19, %v2912_v41 }
  0x60   : > { %v1716_v42 = vmul.f32 %v2738_v57, %v3112_v25  ;;  %v1937_v52 = vadd.f32 %v1855_v5, %v1693_v36  ;;  %v945_v59 = vadd.f32 %v841_v58, %v701_v32  ;;  %v1572_v1 = vrot.slane %v1472_v21, 2 }
  0x61   : > { %v3187_v62 = vmul.f32 %v2738_v57, %v3146_v23  ;;  %v1330_v56 = vsel %vm1317_vm2, %v1328_v26, %v1329_v49  ;;  %v1573_v55 = vrot.slane %v3178_v34, 2  ;;  %v304_v44 = vmul.f32 %v2652_v9, %v2732_v53 }
  0x62   : > { %v1816_v2 = vrot.slane %v1716_v42, 2  ;;  %2512 = vmatmul.mubr.msk.f32.gmra.mrb[2].mxu1 %vm1958_vm3, %v1937_v52  ;;  %v1189_v5 = vadd.f32 %v1085_v39, %v945_v59  ;;  %v372_v54 = vmul.f32 %v2654_v10, %v2961_v35  ;;  %v440_v31 = vmul.f32 %v2656_v11, %v3183_v37 }
  0x63   : > { %v1817_v51 = vrot.slane %v3187_v62, 2  ;;  %v1574_v3 = vsel %vm1317_vm2, %v1572_v1, %v1573_v55  ;;  %v518_v61 = vmul.f32 %v2658_v12, %v2732_v53  ;;  %v3208_v50 = vmul.f32 %v2658_v12, %v2780_v29 }
  0x64   : > { %v763_v47 = vmul.f32 %v2665_v16, %v2961_v35  ;;  %v1434_v40 = vadd.f32 %v1330_v56, %v1189_v5  ;;  %v404_v33 = vadd.f32 %v372_v54, %v304_v44  ;;  %v3217_v8 = vmul.f32 %v2665_v16, %v2998_v43 }
  0x65   : > { %v1818_v60 = vsel %vm1317_vm2, %v1816_v2, %v1817_v51  ;;  %v635_v14 = vrot.slane %v518_v61, 1  ;;  %v636_v28 = vrot.slane %v3208_v50, 1  ;;  %v1007_v38 = vmul.f32 %v2667_v17, %v3183_v37 }
  0x66   : > { %v879_v22 = vrot.slane %v763_v47, 1  ;;  %v1678_v58 = vadd.f32 %v1574_v3, %v1434_v40  ;;  %v472_v36 = vadd.f32 %v440_v31, %v404_v33  ;;  %v880_v32 = vrot.slane %v3217_v8, 1 }
  0x67   : > { %v3228_v26 = vmul.f32 %v2667_v17, %v3220_v13  ;;  %v637_v21 = vsel %vm584_vm1, %v635_v14, %v636_v28  ;;  %v1123_v39 = vrot.slane %v1007_v38, 1  ;;  %v1251_v42 = vmul.f32 %v2669_v18, %v2732_v53  ;;  %v3265_v14 = vld [vmem:[%s2650_s30 + $0x70] sm:$0x3] }
  0x68   : > { %v3237_v52 = vmul.f32 %v2669_v18, %v2780_v29  ;;  %v1922_v59 = vadd.f32 %v1818_v60, %v1678_v58  ;;  %v717_v1 = vadd.f32 %v637_v21, %v472_v36  ;;  %v881_v56 = vsel %vm584_vm1, %v879_v22, %v880_v32 }
  0x69   : > { %v1124_v2 = vrot.slane %v3228_v26, 1  ;;  %v1368_v44 = vrot.slane %v1251_v42, 2  ;;  %v1496_v54 = vmul.f32 %v2671_v19, %v2961_v35  ;;  %v3248_v53 = vmul.f32 %v2671_v19, %v2998_v43 }
  0x6a   : > { %v4575_v5 = vrot.slane %v3237_v52, 2  ;;  %2490 = vmatprep.mubr.msk.f32.mxu0 %vm1958_vm3, %v1922_v59  ;;  %v961_v31 = vadd.f32 %v881_v56, %v717_v1  ;;  %v1740_v61 = vmul.f32 %v2738_v57, %v3183_v37  ;;  %v3258_v47 = vmul.f32 %v2738_v57, %v3220_v13 }
  0x6b   : > { %v1125_v3 = vsel %vm584_vm1, %v1123_v39, %v1124_v2  ;;  %v1612_v60 = vrot.slane %v1496_v54, 2  ;;  %v4574_v33 = vrot.slane %v3248_v53, 2  ;;  %v289_v22 = vmul.f32 %v2652_v9, %v2694_v30 }
  0x6c   : > { %v1370_v40 = vsel %vm1317_vm2, %v1368_v44, %v4575_v5  ;;  %v1205_v38 = vadd.f32 %v1125_v3, %v961_v31  ;;  %v1856_v58 = vrot.slane %v1740_v61, 2  ;;  %v1857_v36 = vrot.slane %v3258_v47, 2 }
  0x6d   : > { %v357_v21 = vmul.f32 %v2654_v10, %v2912_v41  ;;  %v1614_v39 = vsel %vm1317_vm2, %v1612_v60, %v4574_v33  ;;  %v425_v42 = vmul.f32 %v2656_v11, %v3146_v23  ;;  %v496_v59 = vmul.f32 %v2658_v12, %v2824_v7 }
  0x6e   : > { %v741_v30 = vmul.f32 %v2665_v16, %v3043_v45  ;;  %v1450_v1 = vadd.f32 %v1370_v40, %v1205_v38  ;;  %v1858_v56 = vsel %vm1317_vm2, %v1856_v58, %v1857_v36  ;;  %v985_v54 = vmul.f32 %v2667_v17, %v3265_v14 }
  0x6f   : > { %v389_v44 = vadd.f32 %v357_v21, %v289_v22  ;;  %v598_v31 = vrot.slane %v496_v59, 1  ;;  %v1229_v61 = vmul.f32 %v2669_v18, %v2824_v7  ;;  %v1474_v47 = vmul.f32 %v2671_v19, %v3043_v45 }
  0x70   : > { %v842_v3 = vrot.slane %v741_v30, 1  ;;  %v1694_v60 = vadd.f32 %v1614_v39, %v1450_v1  ;;  %v1086_v5 = vrot.slane %v985_v54, 1  ;;  %v1718_v40 = vmul.f32 %v2738_v57, %v3265_v14  ;;  %v3300_v30 = vld [vmem:[%s2650_s30 + $0x130] sm:$0x3] }
  0x71   : > { %v457_v33 = vadd.f32 %v425_v42, %v389_v44  ;;  %v599_v22 = vsel %vm584_vm1, %v596_v46, %v598_v31  ;;  %v1331_v58 = vrot.slane %v1229_v61, 2  ;;  %v1575_v21 = vrot.slane %v1474_v47, 2 }
  0x72   : > { %v843_v38 = vsel %vm584_vm1, %v840_v63, %v842_v3  ;;  %v1938_v7 = vadd.f32 %v1858_v56, %v1694_v60  ;;  %v1087_v39 = vsel %vm584_vm1, %v1084_v6, %v1086_v5  ;;  %v1819_v42 = vrot.slane %v1718_v40, 2 }
  0x73   : > { %v702_v59 = vadd.f32 %v599_v22, %v457_v33  ;;  %v1332_v48 = vsel %vm1317_vm2, %v1329_v49, %v1331_v58  ;;  %v1576_v15 = vsel %vm1317_vm2, %v1573_v55, %v1575_v21  ;;  %v305_v46 = vmul.f32 %v2652_v9, %v2780_v29 }
  0x74   : > { %v373_v63 = vmul.f32 %v2654_v10, %v2998_v43  ;;  %2514 = vmatprep.mubr.msk.f32.mxu1 %vm1958_vm3, %v1938_v7  ;;  %v1820_v6 = vsel %vm1317_vm2, %v1817_v51, %v1819_v42  ;;  %v441_v24 = vmul.f32 %v2656_v11, %v3220_v13  ;;  %v520_v49 = vmul.f32 %v2658_v12, %v2860_v27 }
  0x75   : > { %v946_v0 = vadd.f32 %v843_v38, %v702_v59  ;;  %v765_v29 = vmul.f32 %v2665_v16, %v3078_v20  ;;  %v1009_v55 = vmul.f32 %v2667_v17, %v3300_v30  ;;  %v1253_v5 = vmul.f32 %v2669_v18, %v2860_v27  ;;  %v3334_v27 = vld [vmem:[%s2650_s30 + $0x78] sm:$0xff] }
  0x76   : > { %v405_v34 = vadd.f32 %v373_v63, %v305_v46  ;;  %v638_v33 = vrot.slane %v520_v49, 1  ;;  %v1498_v51 = vmul.f32 %v2671_v19, %v3078_v20  ;;  %v1742_v1 = vmul.f32 %v2738_v57, %v3300_v30 }
  0x77   : > { %v1190_v62 = vadd.f32 %v1087_v39, %v946_v0  ;;  %v882_v44 = vrot.slane %v765_v29, 1  ;;  %v1126_v54 = vrot.slane %v1009_v55, 1  ;;  %v1371_v31 = vrot.slane %v1253_v5, 2 }
  0x78   : > { %v473_v56 = vadd.f32 %v441_v24, %v405_v34  ;;  %v639_v61 = vsel %vm584_vm1, %v636_v28, %v638_v33  ;;  %v1615_v47 = vrot.slane %v1498_v51, 2  ;;  %v1859_v60 = vrot.slane %v1742_v1, 2 }
  0x79   : > { %v1435_v3 = vadd.f32 %v1332_v48, %v1190_v62  ;;  %v883_v22 = vsel %vm584_vm1, %v880_v32, %v882_v44  ;;  %v1127_v38 = vsel %vm584_vm1, %v1124_v2, %v1126_v54  ;;  %v4586_v58 = vrot.slane %v3237_v52, 2 }
  0x7a   : > { %v718_v40 = vadd.f32 %v639_v61, %v473_v56  ;;  %v4587_v28 = vrot.slane %v3248_v53, 2  ;;  %v1860_v59 = vsel %vm1317_vm2, %v1857_v36, %v1859_v60  ;;  %v290_v8 = vmul.f32 %v2652_v9, %v2892_v4 }
  0x7b   : > { %v1372_v50 = vsel %vm1317_vm2, %v4586_v58, %v1371_v31  ;;  %v1679_v21 = vadd.f32 %v1576_v15, %v1435_v3  ;;  %v358_v26 = vmul.f32 %v2654_v10, %v3112_v25  ;;  %v426_v2 = vmul.f32 %v2656_v11, %v3334_v27  ;;  %v3368_v15 = vld [vmem:[%s2650_s30 + $0x80] sm:$0xff] }
  0x7c   : > { %v1616_v7 = vsel %vm1317_vm2, %v4587_v28, %v1615_v47  ;;  %v962_v32 = vadd.f32 %v883_v22, %v718_v40  ;;  %v497_v52 = vmul.f32 %v2658_v12, %v2892_v4  ;;  %v3359_v53 = vmul.f32 %v2658_v12, %v2912_v41  ;;  %v3405_v40 = vld [vmem:[%s2650_s30 + $0x138] sm:$0xff] }
  0x7d   : > { %v1923_v39 = vadd.f32 %v1820_v6, %v1679_v21  ;;  %v742_v36 = vmul.f32 %v2665_v16, %v3112_v25  ;;  %v3365_v42 = vmul.f32 %v2665_v16, %v3146_v23  ;;  %v390_v46 = vadd.f32 %v358_v26, %v290_v8 }
  0x7e   : > { %v1206_v48 = vadd.f32 %v1127_v38, %v962_v32  ;;  %v600_v63 = vrot.slane %v497_v52, 1  ;;  %v986_v0 = vmul.f32 %v2667_v17, %v3334_v27  ;;  %v601_v6 = vrot.slane %v3359_v53, 1 }
  0x7f   : > { %2491 = vmatmul.mubr.msk.f32.gmra.mrb[4].mxu0 %vm1958_vm3, %v1923_v39  ;;  %v844_v24 = vrot.slane %v742_v36, 1  ;;  %v845_v49 = vrot.slane %v3365_v42, 1  ;;  %v3377_v34 = vmul.f32 %v2667_v17, %v3368_v15  ;;  %v458_v55 = vadd.f32 %v426_v2, %v390_v46 }
  0x80   : > { %v1451_v29 = vadd.f32 %v1372_v50, %v1206_v48  ;;  %v1088_v5 = vrot.slane %v986_v0, 1  ;;  %v1230_v62 = vmul.f32 %v2669_v18, %v2892_v4  ;;  %v602_v33 = vsel %vm584_vm1, %v600_v63, %v601_v6 }
  0x81   : > { %v846_v51 = vsel %vm584_vm1, %v844_v24, %v845_v49  ;;  %v1089_v1 = vrot.slane %v3377_v34, 1  ;;  %v3390_v56 = vmul.f32 %v2669_v18, %v2912_v41  ;;  %v703_v54 = vadd.f32 %v602_v33, %v458_v55 }
  0x82   : > { %v1695_v44 = vadd.f32 %v1616_v7, %v1451_v29  ;;  %v1333_v31 = vrot.slane %v1230_v62, 2  ;;  %v1475_v4 = vmul.f32 %v2671_v19, %v3112_v25  ;;  %v3400_v47 = vmul.f32 %v2671_v19, %v3146_v23  ;;  %v3442_v29 = vld [vmem:[%s2650_s30 + $0x140] sm:$0xff] }
  0x83   : > { %v1090_v3 = vsel %vm584_vm1, %v1088_v5, %v1089_v1  ;;  %v1334_v61 = vrot.slane %v3390_v56, 2  ;;  %v1719_v60 = vmul.f32 %v2738_v57, %v3334_v27  ;;  %v947_v38 = vadd.f32 %v846_v51, %v703_v54 }
  0x84   : > { %v1939_v22 = vadd.f32 %v1860_v59, %v1695_v44  ;;  %v1577_v58 = vrot.slane %v1475_v4, 2  ;;  %v3409_v50 = vmul.f32 %v2738_v57, %v3368_v15  ;;  %v1578_v28 = vrot.slane %v3400_v47, 2 }
  0x85   : > { %v1335_v21 = vsel %vm1317_vm2, %v1333_v31, %v1334_v61  ;;  %v1821_v7 = vrot.slane %v1719_v60, 2  ;;  %v306_v8 = vmul.f32 %v2652_v9, %v2961_v35  ;;  %v1191_v59 = vadd.f32 %v1090_v3, %v947_v38 }
  0x86   : > { %2515 = vmatmul.mubr.msk.f32.gmra.mrb[4].mxu1 %vm1958_vm3, %v1939_v22  ;;  %v1822_v32 = vrot.slane %v3409_v50, 2  ;;  %v374_v26 = vmul.f32 %v2654_v10, %v3183_v37  ;;  %v442_v2 = vmul.f32 %v2656_v11, %v3405_v40  ;;  %v1579_v52 = vsel %vm1317_vm2, %v1577_v58, %v1578_v28 }
  0x87   : > { %v521_v39 = vmul.f32 %v2658_v12, %v2961_v35  ;;  %v3430_v36 = vmul.f32 %v2658_v12, %v2998_v43  ;;  %v766_v48 = vmul.f32 %v2665_v16, %v3183_v37  ;;  %v1436_v46 = vadd.f32 %v1335_v21, %v1191_v59 }
  0x88   : > { %v1823_v63 = vsel %vm1317_vm2, %v1821_v7, %v1822_v32  ;;  %v406_v0 = vadd.f32 %v374_v26, %v306_v8  ;;  %v3439_v24 = vmul.f32 %v2665_v16, %v3220_v13  ;;  %v1010_v33 = vmul.f32 %v2667_v17, %v3405_v40 }
  0x89   : > { %v640_v55 = vrot.slane %v521_v39, 1  ;;  %v641_v5 = vrot.slane %v3430_v36, 1  ;;  %v884_v62 = vrot.slane %v766_v48, 1  ;;  %v1680_v51 = vadd.f32 %v1579_v52, %v1436_v46 }
  0x8a   : > { %v474_v44 = vadd.f32 %v442_v2, %v406_v0  ;;  %v885_v54 = vrot.slane %v3439_v24, 1  ;;  %v3450_v31 = vmul.f32 %v2667_v17, %v3442_v29  ;;  %v1128_v3 = vrot.slane %v1010_v33, 1 }
  0x8b   : > { %v642_v4 = vsel %vm584_vm1, %v640_v55, %v641_v5  ;;  %v1254_v60 = vmul.f32 %v2669_v18, %v2961_v35  ;;  %v3459_v22 = vmul.f32 %v2669_v18, %v2998_v43  ;;  %v1924_v38 = vadd.f32 %v1823_v63, %v1680_v51  ;;  %v3487_v55 = vld [vmem:[%s2650_s30 + $0x88] sm:$0x3] }
  0x8c   : > { %v719_v58 = vadd.f32 %v642_v4, %v474_v44  ;;  %v886_v21 = vsel %vm584_vm1, %v884_v62, %v885_v54  ;;  %v1129_v7 = vrot.slane %v3450_v31, 1  ;;  %v1499_v26 = vmul.f32 %v2671_v19, %v3183_v37 }
  0x8d   : > { %v1373_v8 = vrot.slane %v1254_v60, 2  ;;  %v4577_v59 = vrot.slane %v3459_v22, 2  ;;  %v3470_v35 = vmul.f32 %v2671_v19, %v3220_v13  ;;  %2493 = vmatprep.mubr.msk.f32.mxu0 %vm1958_vm3, %v1924_v38  ;;  %v1743_v39 = vmul.f32 %v2738_v57, %v3405_v40 }
  0x8e   : > { %v963_v2 = vadd.f32 %v886_v21, %v719_v58  ;;  %v1130_v52 = vsel %vm584_vm1, %v1128_v3, %v1129_v7  ;;  %v3480_v48 = vmul.f32 %v2738_v57, %v3442_v29  ;;  %v1617_v63 = vrot.slane %v1499_v26, 2 }
  0x8f   : > { %v1375_v46 = vsel %vm1317_vm2, %v1373_v8, %v4577_v59  ;;  %v4576_v0 = vrot.slane %v3470_v35, 2  ;;  %v291_v62 = vmul.f32 %v2652_v9, %v2912_v41  ;;  %v1861_v51 = vrot.slane %v1743_v39, 2 }
  0x90   : > { %v1207_v33 = vadd.f32 %v1130_v52, %v963_v2  ;;  %v1862_v44 = vrot.slane %v3480_v48, 2  ;;  %v359_v4 = vmul.f32 %v2654_v10, %v3146_v23  ;;  %v427_v60 = vmul.f32 %v2656_v11, %v3368_v15 }
  0x91   : > { %v1619_v3 = vsel %vm1317_vm2, %v1617_v63, %v4576_v0  ;;  %v499_v38 = vmul.f32 %v2658_v12, %v3043_v45  ;;  %v744_v41 = vmul.f32 %v2665_v16, %v3265_v14  ;;  %v988_v26 = vmul.f32 %v2667_v17, %v3487_v55 }
  0x92   : > { %v1452_v58 = vadd.f32 %v1375_v46, %v1207_v33  ;;  %v1863_v21 = vsel %vm1317_vm2, %v1861_v51, %v1862_v44  ;;  %v391_v8 = vadd.f32 %v359_v4, %v291_v62  ;;  %v1232_v39 = vmul.f32 %v2669_v18, %v3043_v45 }
  0x93   : > { %v603_v2 = vrot.slane %v499_v38, 1  ;;  %v847_v52 = vrot.slane %v744_v41, 1  ;;  %v1477_v48 = vmul.f32 %v2671_v19, %v3265_v14  ;;  %v1091_v59 = vrot.slane %v988_v26, 1  ;;  %v3522_v41 = vld [vmem:[%s2650_s30 + $0x148] sm:$0x3] }
  0x94   : > { %v1696_v63 = vadd.f32 %v1619_v3, %v1452_v58  ;;  %v459_v0 = vadd.f32 %v427_v60, %v391_v8  ;;  %v1721_v46 = vmul.f32 %v2738_v57, %v3487_v55  ;;  %v1336_v51 = vrot.slane %v1232_v39, 2 }
  0x95   : > { %v604_v62 = vsel %vm584_vm1, %v601_v6, %v603_v2  ;;  %v848_v33 = vsel %vm584_vm1, %v845_v49, %v847_v52  ;;  %v1580_v4 = vrot.slane %v1477_v48, 2  ;;  %v1092_v3 = vsel %vm584_vm1, %v1089_v1, %v1091_v59 }
  0x96   : > { %v1940_v45 = vadd.f32 %v1863_v21, %v1696_v63  ;;  %v704_v38 = vadd.f32 %v604_v62, %v459_v0  ;;  %v1824_v60 = vrot.slane %v1721_v46, 2  ;;  %v1337_v53 = vsel %vm1317_vm2, %v1334_v61, %v1336_v51 }
  0x97   : > { %v1581_v42 = vsel %vm1317_vm2, %v1578_v28, %v1580_v4  ;;  %v307_v6 = vmul.f32 %v2652_v9, %v2998_v43  ;;  %v375_v49 = vmul.f32 %v2654_v10, %v3220_v13  ;;  %v443_v56 = vmul.f32 %v2656_v11, %v3442_v29 }
  0x98   : > { %2517 = vmatprep.mubr.msk.f32.mxu1 %vm1958_vm3, %v1940_v45  ;;  %v948_v34 = vadd.f32 %v848_v33, %v704_v38  ;;  %v1825_v1 = vsel %vm1317_vm2, %v1822_v32, %v1824_v60  ;;  %v523_v61 = vmul.f32 %v2658_v12, %v3078_v20  ;;  %v768_v43 = vmul.f32 %v2665_v16, %v3300_v30 }
  0x99   : > { %v407_v47 = vadd.f32 %v375_v49, %v307_v6  ;;  %v1012_v28 = vmul.f32 %v2667_v17, %v3522_v41  ;;  %v1256_v59 = vmul.f32 %v2669_v18, %v3078_v20  ;;  %v1501_v32 = vmul.f32 %v2671_v19, %v3300_v30  ;;  %v3556_v20 = vld [vmem:[%s2650_s30 + $0x90] sm:$0xff] }
  0x9a   : > { %v1192_v50 = vadd.f32 %v1092_v3, %v948_v34  ;;  %v643_v0 = vrot.slane %v523_v61, 1  ;;  %v1745_v58 = vmul.f32 %v2738_v57, %v3522_v41  ;;  %v887_v8 = vrot.slane %v768_v43, 1 }
  0x9b   : > { %v475_v21 = vadd.f32 %v443_v56, %v407_v47  ;;  %v1131_v26 = vrot.slane %v1012_v28, 1  ;;  %v1376_v2 = vrot.slane %v1256_v59, 2  ;;  %v1620_v48 = vrot.slane %v1501_v32, 2 }
  0x9c   : > { %v1437_v52 = vadd.f32 %v1337_v53, %v1192_v50  ;;  %v644_v39 = vsel %vm584_vm1, %v641_v5, %v643_v0  ;;  %v1864_v63 = vrot.slane %v1745_v58, 2  ;;  %v888_v62 = vsel %vm584_vm1, %v885_v54, %v887_v8 }
  0x9d   : > { %v720_v46 = vadd.f32 %v644_v39, %v475_v21  ;;  %v1132_v33 = vsel %vm584_vm1, %v1129_v7, %v1131_v26  ;;  %v4588_v51 = vrot.slane %v3459_v22, 2  ;;  %v4589_v5 = vrot.slane %v3470_v35, 2 }
  0x9e   : > { %v1681_v4 = vadd.f32 %v1581_v42, %v1437_v52  ;;  %v1865_v38 = vsel %vm1317_vm2, %v1862_v44, %v1864_v63  ;;  %v292_v24 = vmul.f32 %v2652_v9, %v3112_v25  ;;  %v360_v31 = vmul.f32 %v2654_v10, %v3334_v27  ;;  %v3590_v42 = vld [vmem:[%s2650_s30 + $0x98] sm:$0xff] }
  0x9f   : > { %v1377_v36 = vsel %vm1317_vm2, %v4588_v51, %v1376_v2  ;;  %v1621_v45 = vsel %vm1317_vm2, %v4589_v5, %v1620_v48  ;;  %v964_v54 = vadd.f32 %v888_v62, %v720_v46  ;;  %v428_v7 = vmul.f32 %v2656_v11, %v3556_v20  ;;  %v3627_v46 = vld [vmem:[%s2650_s30 + $0x150] sm:$0xff] }
  0xa0   : > { %v500_v22 = vmul.f32 %v2658_v12, %v3112_v25  ;;  %v1925_v3 = vadd.f32 %v1825_v1, %v1681_v4  ;;  %v3581_v35 = vmul.f32 %v2658_v12, %v3146_v23  ;;  %v745_v44 = vmul.f32 %v2665_v16, %v3334_v27 }
  0xa1   : > { %v3587_v60 = vmul.f32 %v2665_v16, %v3368_v15  ;;  %v1208_v53 = vadd.f32 %v1132_v33, %v964_v54  ;;  %v392_v6 = vadd.f32 %v360_v31, %v292_v24  ;;  %v989_v34 = vmul.f32 %v2667_v17, %v3556_v20 }
  0xa2   : > { %v605_v49 = vrot.slane %v500_v22, 1  ;;  %2494 = vmatmul.mubr.msk.f32.gmra.mrb[6].mxu0 %vm1958_vm3, %v1925_v3  ;;  %v606_v1 = vrot.slane %v3581_v35, 1  ;;  %v849_v56 = vrot.slane %v745_v44, 1  ;;  %v3599_v47 = vmul.f32 %v2667_v17, %v3590_v42 }
  0xa3   : > { %v850_v61 = vrot.slane %v3587_v60, 1  ;;  %v1453_v43 = vadd.f32 %v1377_v36, %v1208_v53  ;;  %v460_v28 = vadd.f32 %v428_v7, %v392_v6  ;;  %v1093_v59 = vrot.slane %v989_v34, 1 }
  0xa4   : > { %v1233_v50 = vmul.f32 %v2669_v18, %v3112_v25  ;;  %v607_v0 = vsel %vm584_vm1, %v605_v49, %v606_v1  ;;  %v1094_v58 = vrot.slane %v3599_v47, 1  ;;  %v3612_v21 = vmul.f32 %v2669_v18, %v3146_v23 }
  0xa5   : > { %v851_v32 = vsel %vm584_vm1, %v849_v56, %v850_v61  ;;  %v1697_v8 = vadd.f32 %v1621_v45, %v1453_v43  ;;  %v705_v26 = vadd.f32 %v607_v0, %v460_v28  ;;  %v1478_v25 = vmul.f32 %v2671_v19, %v3334_v27  ;;  %v3664_v43 = vld [vmem:[%s2650_s30 + $0x158] sm:$0xff] }
  0xa6   : > { %v1338_v2 = vrot.slane %v1233_v50, 2  ;;  %v1095_v52 = vsel %vm584_vm1, %v1093_v59, %v1094_v58  ;;  %v1339_v39 = vrot.slane %v3612_v21, 2  ;;  %v3622_v48 = vmul.f32 %v2671_v19, %v3368_v15 }
  0xa7   : > { %v1722_v63 = vmul.f32 %v2738_v57, %v3556_v20  ;;  %v1941_v62 = vadd.f32 %v1865_v38, %v1697_v8  ;;  %v949_v33 = vadd.f32 %v851_v32, %v705_v26  ;;  %v1582_v51 = vrot.slane %v1478_v25, 2 }
  0xa8   : > { %v3631_v36 = vmul.f32 %v2738_v57, %v3590_v42  ;;  %v1340_v4 = vsel %vm1317_vm2, %v1338_v2, %v1339_v39  ;;  %v1583_v5 = vrot.slane %v3622_v48, 2  ;;  %v308_v24 = vmul.f32 %v2652_v9, %v3183_v37 }
  0xa9   : > { %v1826_v45 = vrot.slane %v1722_v63, 2  ;;  %2518 = vmatmul.mubr.msk.f32.gmra.mrb[6].mxu1 %vm1958_vm3, %v1941_v62  ;;  %v1193_v38 = vadd.f32 %v1095_v52, %v949_v33  ;;  %v376_v31 = vmul.f32 %v2654_v10, %v3405_v40  ;;  %v444_v7 = vmul.f32 %v2656_v11, %v3627_v46 }
  0xaa   : > { %v1827_v54 = vrot.slane %v3631_v36, 2  ;;  %v1584_v22 = vsel %vm1317_vm2, %v1582_v51, %v1583_v5  ;;  %v524_v3 = vmul.f32 %v2658_v12, %v3183_v37  ;;  %v3652_v44 = vmul.f32 %v2658_v12, %v3220_v13 }
  0xab   : > { %v769_v53 = vmul.f32 %v2665_v16, %v3405_v40  ;;  %v1438_v6 = vadd.f32 %v1340_v4, %v1193_v38  ;;  %v408_v34 = vadd.f32 %v376_v31, %v308_v24  ;;  %v3661_v56 = vmul.f32 %v2665_v16, %v3442_v29 }
  0xac   : > { %v1828_v49 = vsel %vm1317_vm2, %v1826_v45, %v1827_v54  ;;  %v645_v28 = vrot.slane %v524_v3, 1  ;;  %v646_v59 = vrot.slane %v3652_v44, 1  ;;  %v1013_v0 = vmul.f32 %v2667_v17, %v3627_v46 }
  0xad   : > { %v889_v50 = vrot.slane %v769_v53, 1  ;;  %v1682_v32 = vadd.f32 %v1584_v22, %v1438_v6  ;;  %v476_v8 = vadd.f32 %v444_v7, %v408_v34  ;;  %v890_v26 = vrot.slane %v3661_v56, 1 }
  0xae   : > { %v3672_v2 = vmul.f32 %v2667_v17, %v3664_v43  ;;  %v647_v25 = vsel %vm584_vm1, %v645_v28, %v646_v59  ;;  %v1133_v52 = vrot.slane %v1013_v0, 1  ;;  %v1257_v63 = vmul.f32 %v2669_v18, %v3183_v37  ;;  %v3709_v28 = vld [vmem:[%s2650_s30 + $0xa0] sm:$0x3] }
  0xaf   : > { %v3681_v62 = vmul.f32 %v2669_v18, %v3220_v13  ;;  %v1926_v33 = vadd.f32 %v1828_v49, %v1682_v32  ;;  %v721_v51 = vadd.f32 %v647_v25, %v476_v8  ;;  %v891_v4 = vsel %vm584_vm1, %v889_v50, %v890_v26 }
  0xb0   : > { %v1134_v45 = vrot.slane %v3672_v2, 1  ;;  %v1378_v24 = vrot.slane %v1257_v63, 2  ;;  %v1502_v31 = vmul.f32 %v2671_v19, %v3405_v40  ;;  %v3692_v37 = vmul.f32 %v2671_v19, %v3442_v29 }
  0xb1   : > { %v4579_v38 = vrot.slane %v3681_v62, 2  ;;  %2496 = vmatprep.mubr.msk.f32.mxu0 %vm1958_vm3, %v1926_v33  ;;  %v965_v7 = vadd.f32 %v891_v4, %v721_v51  ;;  %v1746_v3 = vmul.f32 %v2738_v57, %v3627_v46  ;;  %v3702_v53 = vmul.f32 %v2738_v57, %v3664_v43 }
  0xb2   : > { %v1135_v22 = vsel %vm584_vm1, %v1133_v52, %v1134_v45  ;;  %v1622_v49 = vrot.slane %v1502_v31, 2  ;;  %v4578_v34 = vrot.slane %v3692_v37, 2  ;;  %v293_v50 = vmul.f32 %v2652_v9, %v3146_v23 }
  0xb3   : > { %v1380_v6 = vsel %vm1317_vm2, %v1378_v24, %v4579_v38  ;;  %v1209_v0 = vadd.f32 %v1135_v22, %v965_v7  ;;  %v1866_v32 = vrot.slane %v1746_v3, 2  ;;  %v1867_v8 = vrot.slane %v3702_v53, 2 }
  0xb4   : > { %v361_v25 = vmul.f32 %v2654_v10, %v3368_v15  ;;  %v1624_v52 = vsel %vm1317_vm2, %v1622_v49, %v4578_v34  ;;  %v429_v63 = vmul.f32 %v2656_v11, %v3590_v42  ;;  %v502_v33 = vmul.f32 %v2658_v12, %v3265_v14 }
  0xb5   : > { %v747_v23 = vmul.f32 %v2665_v16, %v3487_v55  ;;  %v1454_v51 = vadd.f32 %v1380_v6, %v1209_v0  ;;  %v1868_v4 = vsel %vm1317_vm2, %v1866_v32, %v1867_v8  ;;  %v991_v31 = vmul.f32 %v2667_v17, %v3709_v28 }
  0xb6   : > { %v393_v24 = vadd.f32 %v361_v25, %v293_v50  ;;  %v608_v7 = vrot.slane %v502_v33, 1  ;;  %v1235_v3 = vmul.f32 %v2669_v18, %v3265_v14  ;;  %v1480_v53 = vmul.f32 %v2671_v19, %v3487_v55 }
  0xb7   : > { %v852_v22 = vrot.slane %v747_v23, 1  ;;  %v1698_v49 = vadd.f32 %v1624_v52, %v1454_v51  ;;  %v1096_v38 = vrot.slane %v991_v31, 1  ;;  %v1724_v6 = vmul.f32 %v2738_v57, %v3709_v28  ;;  %v3744_v23 = vld [vmem:[%s2650_s30 + $0x160] sm:$0x3] }
  0xb8   : > { %v461_v34 = vadd.f32 %v429_v63, %v393_v24  ;;  %v609_v50 = vsel %vm584_vm1, %v606_v1, %v608_v7  ;;  %v1341_v32 = vrot.slane %v1235_v3, 2  ;;  %v1585_v25 = vrot.slane %v1480_v53, 2 }
  0xb9   : > { %v853_v0 = vsel %vm584_vm1, %v850_v61, %v852_v22  ;;  %v1942_v14 = vadd.f32 %v1868_v4, %v1698_v49  ;;  %v1097_v52 = vsel %vm584_vm1, %v1094_v58, %v1096_v38  ;;  %v1829_v63 = vrot.slane %v1724_v6, 2 }
  0xba   : > { %v706_v33 = vadd.f32 %v609_v50, %v461_v34  ;;  %v1342_v35 = vsel %vm1317_vm2, %v1339_v39, %v1341_v32  ;;  %v1586_v60 = vsel %vm1317_vm2, %v1583_v5, %v1585_v25  ;;  %v309_v1 = vmul.f32 %v2652_v9, %v3220_v13 }
  0xbb   : > { %v377_v61 = vmul.f32 %v2654_v10, %v3442_v29  ;;  %2520 = vmatprep.mubr.msk.f32.mxu1 %vm1958_vm3, %v1942_v14  ;;  %v1830_v58 = vsel %vm1317_vm2, %v1827_v54, %v1829_v63  ;;  %v445_v21 = vmul.f32 %v2656_v11, %v3664_v43  ;;  %v526_v39 = vmul.f32 %v2658_v12, %v3300_v30 }
  0xbc   : > { %v950_v47 = vadd.f32 %v853_v0, %v706_v33  ;;  %v771_v13 = vmul.f32 %v2665_v16, %v3522_v41  ;;  %v1015_v5 = vmul.f32 %v2667_v17, %v3744_v23  ;;  %v1259_v38 = vmul.f32 %v2669_v18, %v3300_v30  ;;  %v3778_v30 = vld [vmem:[%s2650_s30 + $0xa8] sm:$0xff] }
  0xbd   : > { %v409_v48 = vadd.f32 %v377_v61, %v309_v1  ;;  %v648_v34 = vrot.slane %v526_v39, 1  ;;  %v1504_v54 = vmul.f32 %v2671_v19, %v3522_v41  ;;  %v1748_v51 = vmul.f32 %v2738_v57, %v3744_v23 }
  0xbe   : > { %v1194_v36 = vadd.f32 %v1097_v52, %v950_v47  ;;  %v892_v24 = vrot.slane %v771_v13, 1  ;;  %v1136_v31 = vrot.slane %v1015_v5, 1  ;;  %v1381_v7 = vrot.slane %v1259_v38, 2 }
  0xbf   : > { %v477_v4 = vadd.f32 %v445_v21, %v409_v48  ;;  %v649_v3 = vsel %vm584_vm1, %v646_v59, %v648_v34  ;;  %v1625_v53 = vrot.slane %v1504_v54, 2  ;;  %v1869_v49 = vrot.slane %v1748_v51, 2 }
  0xc0   : > { %v1439_v22 = vadd.f32 %v1342_v35, %v1194_v36  ;;  %v893_v50 = vsel %vm584_vm1, %v890_v26, %v892_v24  ;;  %v1137_v0 = vsel %vm584_vm1, %v1134_v45, %v1136_v31  ;;  %v4590_v32 = vrot.slane %v3681_v62, 2 }
  0xc1   : > { %v722_v6 = vadd.f32 %v649_v3, %v477_v4  ;;  %v4591_v59 = vrot.slane %v3692_v37, 2  ;;  %v1870_v33 = vsel %vm1317_vm2, %v1867_v8, %v1869_v49  ;;  %v294_v56 = vmul.f32 %v2652_v9, %v3334_v27 }
  0xc2   : > { %v1382_v44 = vsel %vm1317_vm2, %v4590_v32, %v1381_v7  ;;  %v1683_v25 = vadd.f32 %v1586_v60, %v1439_v22  ;;  %v362_v2 = vmul.f32 %v2654_v10, %v3556_v20  ;;  %v430_v45 = vmul.f32 %v2656_v11, %v3778_v30  ;;  %v3812_v60 = vld [vmem:[%s2650_s30 + $0xb0] sm:$0xff] }
  0xc3   : > { %v1626_v14 = vsel %vm1317_vm2, %v4591_v59, %v1625_v53  ;;  %v966_v26 = vadd.f32 %v893_v50, %v722_v6  ;;  %v503_v62 = vmul.f32 %v2658_v12, %v3334_v27  ;;  %v3803_v37 = vmul.f32 %v2658_v12, %v3368_v15  ;;  %v3849_v6 = vld [vmem:[%s2650_s30 + $0x168] sm:$0xff] }
  0xc4   : > { %v1927_v52 = vadd.f32 %v1830_v58, %v1683_v25  ;;  %v748_v8 = vmul.f32 %v2665_v16, %v3556_v20  ;;  %v3809_v63 = vmul.f32 %v2665_v16, %v3590_v42  ;;  %v394_v1 = vadd.f32 %v362_v2, %v294_v56 }
  0xc5   : > { %v1210_v35 = vadd.f32 %v1137_v0, %v966_v26  ;;  %v610_v61 = vrot.slane %v503_v62, 1  ;;  %v992_v47 = vmul.f32 %v2667_v17, %v3778_v30  ;;  %v611_v58 = vrot.slane %v3803_v37, 1 }
  0xc6   : > { %2497 = vmatmul.mubr.msk.f32.gmra.mrb[8].mxu0 %vm1958_vm3, %v1927_v52  ;;  %v854_v21 = vrot.slane %v748_v8, 1  ;;  %v855_v39 = vrot.slane %v3809_v63, 1  ;;  %v3821_v48 = vmul.f32 %v2667_v17, %v3812_v60  ;;  %v462_v5 = vadd.f32 %v430_v45, %v394_v1 }
  0xc7   : > { %v1455_v13 = vadd.f32 %v1382_v44, %v1210_v35  ;;  %v1098_v38 = vrot.slane %v992_v47, 1  ;;  %v1236_v36 = vmul.f32 %v2669_v18, %v3334_v27  ;;  %v612_v34 = vsel %vm584_vm1, %v610_v61, %v611_v58 }
  0xc8   : > { %v856_v54 = vsel %vm584_vm1, %v854_v21, %v855_v39  ;;  %v1099_v51 = vrot.slane %v3821_v48, 1  ;;  %v3834_v4 = vmul.f32 %v2669_v18, %v3368_v15  ;;  %v707_v31 = vadd.f32 %v612_v34, %v462_v5 }
  0xc9   : > { %v1699_v24 = vadd.f32 %v1626_v14, %v1455_v13  ;;  %v1343_v7 = vrot.slane %v1236_v36, 2  ;;  %v1481_v27 = vmul.f32 %v2671_v19, %v3556_v20  ;;  %v3844_v53 = vmul.f32 %v2671_v19, %v3590_v42  ;;  %v3886_v13 = vld [vmem:[%s2650_s30 + $0x170] sm:$0xff] }
  0xca   : > { %v1100_v22 = vsel %vm584_vm1, %v1098_v38, %v1099_v51  ;;  %v1344_v3 = vrot.slane %v3834_v4, 2  ;;  %v1725_v49 = vmul.f32 %v2738_v57, %v3778_v30  ;;  %v951_v0 = vadd.f32 %v856_v54, %v707_v31 }
  0xcb   : > { %v1943_v50 = vadd.f32 %v1870_v33, %v1699_v24  ;;  %v1587_v32 = vrot.slane %v1481_v27, 2  ;;  %v3853_v44 = vmul.f32 %v2738_v57, %v3812_v60  ;;  %v1588_v59 = vrot.slane %v3844_v53, 2 }
  0xcc   : > { %v1345_v25 = vsel %vm1317_vm2, %v1343_v7, %v1344_v3  ;;  %v1831_v14 = vrot.slane %v1725_v49, 2  ;;  %v310_v56 = vmul.f32 %v2652_v9, %v3405_v40  ;;  %v1195_v33 = vadd.f32 %v1100_v22, %v951_v0 }
  0xcd   : > { %2521 = vmatmul.mubr.msk.f32.gmra.mrb[8].mxu1 %vm1958_vm3, %v1943_v50  ;;  %v1832_v26 = vrot.slane %v3853_v44, 2  ;;  %v378_v2 = vmul.f32 %v2654_v10, %v3627_v46  ;;  %v446_v45 = vmul.f32 %v2656_v11, %v3849_v6  ;;  %v1589_v62 = vsel %vm1317_vm2, %v1587_v32, %v1588_v59 }
  0xce   : > { %v527_v52 = vmul.f32 %v2658_v12, %v3405_v40  ;;  %v3874_v8 = vmul.f32 %v2658_v12, %v3442_v29  ;;  %v772_v35 = vmul.f32 %v2665_v16, %v3627_v46  ;;  %v1440_v1 = vadd.f32 %v1345_v25, %v1195_v33 }
  0xcf   : > { %v1833_v61 = vsel %vm1317_vm2, %v1831_v14, %v1832_v26  ;;  %v410_v47 = vadd.f32 %v378_v2, %v310_v56  ;;  %v3883_v21 = vmul.f32 %v2665_v16, %v3664_v43  ;;  %v1016_v34 = vmul.f32 %v2667_v17, %v3849_v6 }
  0xd0   : > { %v650_v5 = vrot.slane %v527_v52, 1  ;;  %v651_v38 = vrot.slane %v3874_v8, 1  ;;  %v894_v36 = vrot.slane %v772_v35, 1  ;;  %v1684_v54 = vadd.f32 %v1589_v62, %v1440_v1 }
  0xd1   : > { %v478_v24 = vadd.f32 %v446_v45, %v410_v47  ;;  %v895_v31 = vrot.slane %v3883_v21, 1  ;;  %v3894_v7 = vmul.f32 %v2667_v17, %v3886_v13  ;;  %v1138_v22 = vrot.slane %v1016_v34, 1 }
  0xd2   : > { %v652_v27 = vsel %vm584_vm1, %v650_v5, %v651_v38  ;;  %v1260_v49 = vmul.f32 %v2669_v18, %v3405_v40  ;;  %v3903_v50 = vmul.f32 %v2669_v18, %v3442_v29  ;;  %v1928_v0 = vadd.f32 %v1833_v61, %v1684_v54  ;;  %v3931_v5 = vld [vmem:[%s2650_s30 + $0xb8] sm:$0x3] }
  0xd3   : > { %v723_v32 = vadd.f32 %v652_v27, %v478_v24  ;;  %v896_v25 = vsel %vm584_vm1, %v894_v36, %v895_v31  ;;  %v1139_v14 = vrot.slane %v3894_v7, 1  ;;  %v1505_v2 = vmul.f32 %v2671_v19, %v3627_v46  ;;  %v4017_v7 = vld [vmem:[%s2650_s30 + $0xc0] sm:$0xff] }
  0xd4   : > { %v1383_v56 = vrot.slane %v1260_v49, 2  ;;  %v4581_v33 = vrot.slane %v3903_v50, 2  ;;  %v3914_v40 = vmul.f32 %v2671_v19, %v3664_v43  ;;  %2499 = vmatprep.mubr.msk.f32.mxu0 %vm1958_vm3, %v1928_v0  ;;  %v1749_v52 = vmul.f32 %v2738_v57, %v3849_v6 }
  0xd5   : > { %v967_v45 = vadd.f32 %v896_v25, %v723_v32  ;;  %v1140_v62 = vsel %vm584_vm1, %v1138_v22, %v1139_v14  ;;  %v3924_v35 = vmul.f32 %v2738_v57, %v3886_v13  ;;  %v1627_v61 = vrot.slane %v1505_v2, 2 }
  0xd6   : > { %v1385_v1 = vsel %vm1317_vm2, %v1383_v56, %v4581_v33  ;;  %v4580_v47 = vrot.slane %v3914_v40, 2  ;;  %v295_v36 = vmul.f32 %v2652_v9, %v3368_v15  ;;  %v1871_v54 = vrot.slane %v1749_v52, 2 }
  0xd7   : > { %v1211_v34 = vadd.f32 %v1140_v62, %v967_v45  ;;  %v1872_v24 = vrot.slane %v3924_v35, 2  ;;  %v363_v27 = vmul.f32 %v2654_v10, %v3590_v42  ;;  %v431_v49 = vmul.f32 %v2656_v11, %v3812_v60 }
  0xd8   : > { %v1629_v22 = vsel %vm1317_vm2, %v1627_v61, %v4580_v47  ;;  %v505_v0 = vmul.f32 %v2658_v12, %v3487_v55  ;;  %v750_v15 = vmul.f32 %v2665_v16, %v3709_v28  ;;  %v994_v2 = vmul.f32 %v2667_v17, %v3931_v5 }
  0xd9   : > { %v1456_v32 = vadd.f32 %v1385_v1, %v1211_v34  ;;  %v1873_v25 = vsel %vm1317_vm2, %v1871_v54, %v1872_v24  ;;  %v395_v56 = vadd.f32 %v363_v27, %v295_v36  ;;  %v1238_v52 = vmul.f32 %v2669_v18, %v3487_v55 }
  0xda   : > { %v613_v45 = vrot.slane %v505_v0, 1  ;;  %v857_v62 = vrot.slane %v750_v15, 1  ;;  %v1483_v35 = vmul.f32 %v2671_v19, %v3709_v28  ;;  %v1101_v33 = vrot.slane %v994_v2, 1  ;;  %v3966_v15 = vld [vmem:[%s2650_s30 + $0x178] sm:$0x3] }
  0xdb   : > { %v1700_v61 = vadd.f32 %v1629_v22, %v1456_v32  ;;  %v463_v47 = vadd.f32 %v431_v49, %v395_v56  ;;  %v1727_v1 = vmul.f32 %v2738_v57, %v3931_v5  ;;  %v1346_v54 = vrot.slane %v1238_v52, 2 }
  0xdc   : > { %v614_v36 = vsel %vm584_vm1, %v611_v58, %v613_v45  ;;  %v858_v34 = vsel %vm584_vm1, %v855_v39, %v857_v62  ;;  %v1590_v27 = vrot.slane %v1483_v35, 2  ;;  %v1102_v22 = vsel %vm584_vm1, %v1099_v51, %v1101_v33 }
  0xdd   : > { %v1944_v55 = vadd.f32 %v1873_v25, %v1700_v61  ;;  %v708_v0 = vadd.f32 %v614_v36, %v463_v47  ;;  %v1834_v49 = vrot.slane %v1727_v1, 2  ;;  %v1347_v37 = vsel %vm1317_vm2, %v1344_v3, %v1346_v54 }
  0xde   : > { %v1591_v63 = vsel %vm1317_vm2, %v1588_v59, %v1590_v27  ;;  %v311_v58 = vmul.f32 %v2652_v9, %v3442_v29  ;;  %v379_v39 = vmul.f32 %v2654_v10, %v3664_v43  ;;  %v447_v4 = vmul.f32 %v2656_v11, %v3886_v13 }
  0xdf   : > { %2523 = vmatprep.mubr.msk.f32.mxu1 %vm1958_vm3, %v1944_v55  ;;  %v952_v48 = vadd.f32 %v858_v34, %v708_v0  ;;  %v1835_v51 = vsel %vm1317_vm2, %v1832_v26, %v1834_v49  ;;  %v529_v3 = vmul.f32 %v2658_v12, %v3522_v41  ;;  %v774_v29 = vmul.f32 %v2665_v16, %v3744_v23 }
  0xe0   : > { %v411_v53 = vadd.f32 %v379_v39, %v311_v58  ;;  %v1018_v59 = vmul.f32 %v2667_v17, %v3966_v15  ;;  %v1262_v33 = vmul.f32 %v2669_v18, %v3522_v41  ;;  %v1507_v26 = vmul.f32 %v2671_v19, %v3744_v23 }
  0xe1   : > { %v1196_v47 = vadd.f32 %v1102_v22, %v952_v48  ;;  %v653_v44 = vrot.slane %v529_v3, 1  ;;  %v1751_v32 = vmul.f32 %v2738_v57, %v3966_v15  ;;  %v897_v56 = vrot.slane %v774_v29, 1  ;;  %v4039_v3 = vld [vmem:[%s2650_s30 + $0xc8] sm:$0xff] }
  0xe2   : > { %v479_v25 = vadd.f32 %v447_v4, %v411_v53  ;;  %v1141_v2 = vrot.slane %v1018_v59, 1  ;;  %v1386_v45 = vrot.slane %v1262_v33, 2  ;;  %v1630_v35 = vrot.slane %v1507_v26, 2 }
  0xe3   : > { %v1441_v62 = vadd.f32 %v1347_v37, %v1196_v47  ;;  %v654_v52 = vsel %vm584_vm1, %v651_v38, %v653_v44  ;;  %v1874_v41 = vrot.slane %v1751_v32, 2  ;;  %v898_v1 = vsel %vm584_vm1, %v895_v31, %v897_v56 }
  0xe4   : > { %v724_v61 = vadd.f32 %v654_v52, %v479_v25  ;;  %v1142_v36 = vsel %vm584_vm1, %v1139_v14, %v1141_v2  ;;  %v4592_v34 = vrot.slane %v3903_v50, 2  ;;  %v4593_v8 = vrot.slane %v3914_v40, 2 }
  0xe5   : > { %v1685_v27 = vadd.f32 %v1591_v63, %v1441_v62  ;;  %v1875_v55 = vsel %vm1317_vm2, %v1872_v24, %v1874_v41  ;;  %v296_v21 = vmul.f32 %v2652_v9, %v3556_v20  ;;  %v364_v31 = vmul.f32 %v2654_v10, %v3778_v30 }
  0xe6   : > { %v1387_v54 = vsel %vm1317_vm2, %v4592_v34, %v1386_v45  ;;  %v1631_v38 = vsel %vm1317_vm2, %v4593_v8, %v1630_v35  ;;  %v968_v0 = vadd.f32 %v898_v1, %v724_v61  ;;  %v432_v50 = vmul.f32 %v4017_v7, %v2656_v11  ;;  %v4071_v61 = vld [vmem:[%s2650_s30 + $0x180] sm:$0xff] }
  0xe7   : > { %v506_v14 = vmul.f32 %v2658_v12, %v3556_v20  ;;  %v1929_v40 = vadd.f32 %v1835_v51, %v1685_v27  ;;  %v4025_v24 = vmul.f32 %v2658_v12, %v3590_v42  ;;  %v751_v22 = vmul.f32 %v2665_v16, %v3778_v30 }
  0xe8   : > { %v4031_v49 = vmul.f32 %v2665_v16, %v3812_v60  ;;  %v1212_v37 = vadd.f32 %v1142_v36, %v968_v0  ;;  %v396_v63 = vadd.f32 %v364_v31, %v296_v21  ;;  %v995_v39 = vmul.f32 %v4017_v7, %v2667_v17 }
  0xe9   : > { %v615_v58 = vrot.slane %v506_v14, 1  ;;  %2500 = vmatmul.mubr.msk.f32.gmra.mrb[10].mxu0 %vm1958_vm3, %v1929_v40  ;;  %v616_v48 = vrot.slane %v4025_v24, 1  ;;  %v859_v51 = vrot.slane %v751_v22, 1  ;;  %v4043_v53 = vmul.f32 %v4039_v3, %v2667_v17 }
  0xea   : > { %v860_v4 = vrot.slane %v4031_v49, 1  ;;  %v1457_v29 = vadd.f32 %v1387_v54, %v1212_v37  ;;  %v464_v59 = vadd.f32 %v432_v50, %v396_v63  ;;  %v1103_v33 = vrot.slane %v995_v39, 1 }
  0xeb   : > { %v1239_v47 = vmul.f32 %v2669_v18, %v3556_v20  ;;  %v617_v44 = vsel %vm584_vm1, %v615_v58, %v616_v48  ;;  %v1104_v32 = vrot.slane %v4043_v53, 1  ;;  %v4056_v25 = vmul.f32 %v2669_v18, %v3590_v42 }
  0xec   : > { %v861_v26 = vsel %vm584_vm1, %v859_v51, %v860_v4  ;;  %v1701_v56 = vadd.f32 %v1631_v38, %v1457_v29  ;;  %v709_v2 = vadd.f32 %v617_v44, %v464_v59  ;;  %v1484_v20 = vmul.f32 %v2671_v19, %v3778_v30  ;;  %v4108_v29 = vld [vmem:[%s2650_s30 + $0x188] sm:$0xff] }
  0xed   : > { %v1348_v45 = vrot.slane %v1239_v47, 2  ;;  %v1105_v62 = vsel %vm584_vm1, %v1103_v33, %v1104_v32  ;;  %v1349_v52 = vrot.slane %v4056_v25, 2  ;;  %v4066_v35 = vmul.f32 %v2671_v19, %v3812_v60 }
  0xee   : > { %v1728_v41 = vmul.f32 %v4017_v7, %v2738_v57  ;;  %v1945_v1 = vadd.f32 %v1875_v55, %v1701_v56  ;;  %v953_v36 = vadd.f32 %v861_v26, %v709_v2  ;;  %v1592_v34 = vrot.slane %v1484_v20, 2 }
  0xef   : > { %v4075_v54 = vmul.f32 %v4039_v3, %v2738_v57  ;;  %v1350_v27 = vsel %vm1317_vm2, %v1348_v45, %v1349_v52  ;;  %v1593_v8 = vrot.slane %v4066_v35, 2  ;;  %v312_v21 = vmul.f32 %v2652_v9, %v3627_v46 }
  0xf0   : > { %v1836_v38 = vrot.slane %v1728_v41, 2  ;;  %2524 = vmatmul.mubr.msk.f32.gmra.mrb[10].mxu1 %vm1958_vm3, %v1945_v1  ;;  %v1197_v55 = vadd.f32 %v1105_v62, %v953_v36  ;;  %v380_v31 = vmul.f32 %v2654_v10, %v3849_v6  ;;  %v448_v50 = vmul.f32 %v2656_v11, %v4071_v61 }
  0xf1   : > { %v1837_v0 = vrot.slane %v4075_v54, 2  ;;  %v1594_v14 = vsel %vm1317_vm2, %v1592_v34, %v1593_v8  ;;  %v530_v40 = vmul.f32 %v2658_v12, %v3627_v46  ;;  %v4096_v22 = vmul.f32 %v2658_v12, %v3664_v43 }
  0xf2   : > { %v775_v37 = vmul.f32 %v2665_v16, %v3849_v6  ;;  %v1442_v63 = vadd.f32 %v1350_v27, %v1197_v55  ;;  %v412_v39 = vadd.f32 %v380_v31, %v312_v21  ;;  %v4105_v51 = vmul.f32 %v2665_v16, %v3886_v13 }
  0xf3   : > { %v1838_v58 = vsel %vm1317_vm2, %v1836_v38, %v1837_v0  ;;  %v655_v59 = vrot.slane %v530_v40, 1  ;;  %v656_v33 = vrot.slane %v4096_v22, 1  ;;  %v1019_v44 = vmul.f32 %v2667_v17, %v4071_v61 }
  0xf4   : > { %v899_v47 = vrot.slane %v775_v37, 1  ;;  %v1686_v26 = vadd.f32 %v1594_v14, %v1442_v63  ;;  %v480_v56 = vadd.f32 %v448_v50, %v412_v39  ;;  %v900_v2 = vrot.slane %v4105_v51, 1 }
  0xf5   : > { %v4116_v45 = vmul.f32 %v2667_v17, %v4108_v29  ;;  %v657_v20 = vsel %vm584_vm1, %v655_v59, %v656_v33  ;;  %v1143_v62 = vrot.slane %v1019_v44, 1  ;;  %v1263_v41 = vmul.f32 %v2669_v18, %v3627_v46 }
  0xf6   : > { %v4125_v1 = vmul.f32 %v2669_v18, %v3664_v43  ;;  %v1930_v36 = vadd.f32 %v1838_v58, %v1686_v26  ;;  %v725_v34 = vadd.f32 %v657_v20, %v480_v56  ;;  %v901_v27 = vsel %vm584_vm1, %v899_v47, %v900_v2 }
  0xf7   : > { %v1144_v38 = vrot.slane %v4116_v45, 1  ;;  %v1388_v21 = vrot.slane %v1263_v41, 2  ;;  %v1508_v31 = vmul.f32 %v2671_v19, %v3849_v6  ;;  %v4136_v46 = vmul.f32 %v2671_v19, %v3886_v13  ;;  %v2562_v45 = vld [vmem:[%s2650_s30 + $0xd8] sm:$0xff] }
  0xf8   : > { %v1389_v55 = vrot.slane %v4125_v1, 2  ;;  %2502 = vmatprep.mubr.msk.f32.mxu0 %vm1958_vm3, %v1930_v36  ;;  %v969_v50 = vadd.f32 %v901_v27, %v725_v34  ;;  %v1752_v40 = vmul.f32 %v2738_v57, %v4071_v61  ;;  %v4146_v37 = vmul.f32 %v2738_v57, %v4108_v29 }
  0xf9   : > { %v1145_v14 = vsel %vm584_vm1, %v1143_v62, %v1144_v38  ;;  %v1632_v58 = vrot.slane %v1508_v31, 2  ;;  %v4582_v39 = vrot.slane %v4136_v46, 2  ;;  %v297_v59 = vmul.f32 %v2652_v9, %v3590_v42 }
  0xfa   : > { %v1390_v63 = vsel %vm1317_vm2, %v1388_v21, %v1389_v55  ;;  %v1213_v47 = vadd.f32 %v1145_v14, %v969_v50  ;;  %v1876_v44 = vrot.slane %v1752_v40, 2  ;;  %v1877_v26 = vrot.slane %v4146_v37, 2  ;;  %v4168_v21 = vld [vmem:[%s2650_s30 + $0xd0] sm:$0x3] }
  0xfb   : > { %v365_v56 = vmul.f32 %v2654_v10, %v3812_v60  ;;  %v1634_v20 = vsel %vm1317_vm2, %v1632_v58, %v4582_v39  ;;  %v433_v62 = vmul.f32 %v4039_v3, %v2656_v11  ;;  %v508_v41 = vmul.f32 %v2658_v12, %v3709_v28 }
  0xfc   : > { %v753_v42 = vmul.f32 %v2665_v16, %v3931_v5  ;;  %v1458_v36 = vadd.f32 %v1390_v63, %v1213_v47  ;;  %v1878_v34 = vsel %vm1317_vm2, %v1876_v44, %v1877_v26  ;;  %v997_v31 = vmul.f32 %v4168_v21, %v2667_v17 }
  0xfd   : > { %v397_v27 = vadd.f32 %v365_v56, %v297_v59  ;;  %v618_v50 = vrot.slane %v508_v41, 1  ;;  %v1241_v40 = vmul.f32 %v2669_v18, %v3709_v28  ;;  %v1486_v37 = vmul.f32 %v2671_v19, %v3931_v5 }
  0xfe   : > { %v862_v14 = vrot.slane %v753_v42, 1  ;;  %v1702_v58 = vadd.f32 %v1634_v20, %v1458_v36  ;;  %v1106_v63 = vrot.slane %v997_v31, 1  ;;  %v1730_v59 = vmul.f32 %v4168_v21, %v2738_v57  ;;  %v4188_v36 = vld [vmem:[%s2650_s30 + $0x190] sm:$0x3] }
  0xff   : > { %v465_v39 = vadd.f32 %v433_v62, %v397_v27  ;;  %v619_v47 = vsel %vm584_vm1, %v616_v48, %v618_v50  ;;  %v1351_v56 = vrot.slane %v1241_v40, 2  ;;  %v1595_v41 = vrot.slane %v1486_v37, 2 }
 0x100   : > { %v863_v44 = vsel %vm584_vm1, %v860_v4, %v862_v14  ;;  %v1946_v28 = vadd.f32 %v1878_v34, %v1702_v58  ;;  %v1107_v20 = vsel %vm584_vm1, %v1104_v32, %v1106_v63  ;;  %v1839_v62 = vrot.slane %v1730_v59, 2 }
 0x101   : > { %v710_v42 = vadd.f32 %v619_v47, %v465_v39  ;;  %v1352_v24 = vsel %vm1317_vm2, %v1349_v52, %v1351_v56  ;;  %v1596_v49 = vsel %vm1317_vm2, %v1593_v8, %v1595_v41  ;;  %v313_v48 = vmul.f32 %v2652_v9, %v3664_v43 }
 0x102   : > { %v381_v4 = vmul.f32 %v2654_v10, %v3886_v13  ;;  %2526 = vmatprep.mubr.msk.f32.mxu1 %vm1958_vm3, %v1946_v28  ;;  %v1840_v32 = vsel %vm1317_vm2, %v1837_v0, %v1839_v62  ;;  %v449_v25 = vmul.f32 %v2656_v11, %v4108_v29  ;;  %v532_v52 = vmul.f32 %v2658_v12, %v3744_v23 }
 0x103   : > { %v954_v53 = vadd.f32 %v863_v44, %v710_v42  ;;  %v777_v43 = vmul.f32 %v2665_v16, %v3966_v15  ;;  %v1021_v8 = vmul.f32 %v2667_v17, %v4188_v36  ;;  %v1265_v39 = vmul.f32 %v2669_v18, %v3744_v23 }
 0x104   : > { %v413_v35 = vadd.f32 %v381_v4, %v313_v48  ;;  %v658_v54 = vrot.slane %v532_v52, 1  ;;  %v1510_v0 = vmul.f32 %v2671_v19, %v3966_v15  ;;  %v1754_v27 = vmul.f32 %v2738_v57, %v4188_v36 }
 0x105   : > { %v1198_v34 = vadd.f32 %v1107_v20, %v954_v53  ;;  %v902_v50 = vrot.slane %v777_v43, 1  ;;  %v1146_v14 = vrot.slane %v1021_v8, 1  ;;  %v1391_v40 = vrot.slane %v1265_v39, 2 }
 0x106   : > { %v481_v31 = vadd.f32 %v449_v25, %v413_v35  ;;  %v659_v58 = vsel %vm584_vm1, %v656_v33, %v658_v54  ;;  %v1635_v63 = vrot.slane %v1510_v0, 2  ;;  %v1879_v23 = vrot.slane %v1754_v27, 2  ;;  %v4257_v25 = vld [vmem:[%s2650_s30 + $0xe0] sm:$0xff] }
 0x107   : > { %v1443_v37 = vadd.f32 %v1352_v24, %v1198_v34  ;;  %v903_v47 = vsel %vm584_vm1, %v900_v2, %v902_v50  ;;  %v1147_v44 = vsel %vm584_vm1, %v1144_v38, %v1146_v14  ;;  %v1392_v56 = vsel %vm1317_vm2, %v1389_v55, %v1391_v40 }
 0x108   : > { %v726_v59 = vadd.f32 %v659_v58, %v481_v31  ;;  %v4594_v22 = vrot.slane %v4136_v46, 2  ;;  %v1880_v28 = vsel %vm1317_vm2, %v1877_v26, %v1879_v23  ;;  %v298_v51 = vmul.f32 %v2652_v9, %v3778_v30 }
 0x109   : > { %v1687_v41 = vadd.f32 %v1596_v49, %v1443_v37  ;;  %v366_v2 = vmul.f32 %v4017_v7, %v2654_v10  ;;  %v434_v1 = vmul.f32 %v2562_v45, %v2656_v11  ;;  %v509_v38 = vmul.f32 %v2658_v12, %v3778_v30 }
 0x10a   : > { %v1636_v33 = vsel %vm1317_vm2, %v4594_v22, %v1635_v63  ;;  %v970_v42 = vadd.f32 %v903_v47, %v726_v59  ;;  %v4244_v46 = vmul.f32 %v2658_v12, %v3812_v60  ;;  %v754_v26 = vmul.f32 %v4017_v7, %v2665_v16  ;;  %v4263_v35 = vpop.f32.mrb[0].mxu0  ;;  %v274_v47 = vld [vmem:[%s2650_s30 + $0x198] sm:$0xff] }
 0x10b   : > { %v1931_v55 = vadd.f32 %v1840_v32, %v1687_v41  ;;  %v4250_v20 = vmul.f32 %v4039_v3, %v2665_v16  ;;  %v398_v24 = vadd.f32 %v366_v2, %v298_v51  ;;  %v620_v49 = vrot.slane %v509_v38, 1  ;;  %v4267_v54 = vpop.f32.mrb[1].mxu0 }
 0x10c   : > { %v1214_v62 = vadd.f32 %v1147_v44, %v970_v42  ;;  %v998_v48 = vmul.f32 %v2562_v45, %v2667_v17  ;;  %v621_v4 = vrot.slane %v4244_v46, 1  ;;  %v864_v53 = vrot.slane %v754_v26, 1 }
 0x10d   : > { %2503 = vmatmul.mubr.msk.f32.gmra.mrb[12].mxu0 %vm1958_vm3, %v1931_v55  ;;  %v865_v32 = vrot.slane %v4250_v20, 1  ;;  %v4261_v52 = vmul.f32 %v4257_v25, %v2667_v17  ;;  %v466_v8 = vadd.f32 %v434_v1, %v398_v24  ;;  %v1242_v34 = vmul.f32 %v2669_v18, %v3778_v30 }
 0x10e   : > { %v1459_v43 = vadd.f32 %v1392_v56, %v1214_v62  ;;  %v1108_v39 = vrot.slane %v998_v48, 1  ;;  %v622_v0 = vsel %vm584_vm1, %v620_v49, %v621_v4  ;;  %v4278_v50 = vmul.f32 %v2669_v18, %v3812_v60 }
 0x10f   : > { %v866_v27 = vsel %vm584_vm1, %v864_v53, %v865_v32  ;;  %v1109_v31 = vrot.slane %v4261_v52, 1  ;;  %v711_v40 = vadd.f32 %v622_v0, %v466_v8  ;;  %v1353_v37 = vrot.slane %v1242_v34, 2  ;;  %v275_v8 = vld [vmem:[%s2650_s30 + $0x1a0] sm:$0xff] }
 0x110   : > { %v1703_v14 = vadd.f32 %v1636_v33, %v1459_v43  ;;  %v1487_v30 = vmul.f32 %v4017_v7, %v2671_v19  ;;  %v1354_v63 = vrot.slane %v4278_v50, 2  ;;  %v4288_v23 = vmul.f32 %v4039_v3, %v2671_v19 }
 0x111   : > { %v1110_v58 = vsel %vm584_vm1, %v1108_v39, %v1109_v31  ;;  %v1731_v59 = vmul.f32 %v2562_v45, %v2738_v57  ;;  %v955_v56 = vadd.f32 %v866_v27, %v711_v40  ;;  %v4294_v22 = vmul.f32 %v4257_v25, %v2738_v57 }
 0x112   : > { %v1947_v44 = vadd.f32 %v1880_v28, %v1703_v14  ;;  %v1597_v41 = vrot.slane %v1487_v30, 2  ;;  %v1355_v7 = vsel %vm1317_vm2, %v1353_v37, %v1354_v63  ;;  %v1598_v33 = vrot.slane %v4288_v23, 2  ;;  %v4316_v62 = vpop.f32.mrb[0].mxu1 }
 0x113   : > { %v1841_v51 = vrot.slane %v1731_v59, 2  ;;  %v314_v42 = vmul.f32 %v2652_v9, %v3849_v6  ;;  %v1199_v28 = vadd.f32 %v1110_v58, %v955_v56  ;;  %v1842_v2 = vrot.slane %v4294_v22, 2  ;;  %v4323_v43 = vpop.f32.mrb[1].mxu1 }
 0x114   : > { %2527 = vmatmul.mubr.msk.f32.gmra.mrb[12].mxu1 %vm1958_vm3, %v1947_v44  ;;  %v382_v45 = vmul.f32 %v2654_v10, %v4071_v61  ;;  %v450_v1 = vmul.f32 %v2656_v11, %v274_v47  ;;  %v1599_v38 = vsel %vm1317_vm2, %v1597_v41, %v1598_v33  ;;  %v533_v55 = vmul.f32 %v2658_v12, %v3849_v6 }
 0x115   : > { %v4314_v26 = vmul.f32 %v2658_v12, %v3886_v13  ;;  %v1444_v24 = vadd.f32 %v1355_v7, %v1199_v28  ;;  %v1843_v49 = vsel %vm1317_vm2, %v1841_v51, %v1842_v2  ;;  %v778_v53 = vmul.f32 %v2665_v16, %v4071_v61 }
 0x116   : > { %v414_v48 = vadd.f32 %v382_v45, %v314_v42  ;;  %v660_v39 = vrot.slane %v533_v55, 1  ;;  %v4329_v0 = vmul.f32 %v2665_v16, %v4108_v29  ;;  %v1022_v27 = vmul.f32 %v2667_v17, %v274_v47 }
 0x117   : > { %v661_v34 = vrot.slane %v4314_v26, 1  ;;  %v1688_v14 = vadd.f32 %v1599_v38, %v1444_v24  ;;  %v904_v37 = vrot.slane %v778_v53, 1  ;;  %v4333_v30 = vmul.f32 %v2667_v17, %v275_v8 }
 0x118   : > { %v482_v40 = vadd.f32 %v450_v1, %v414_v48  ;;  %v905_v59 = vrot.slane %v4329_v0, 1  ;;  %v1148_v44 = vrot.slane %v1022_v27, 1  ;;  %v1266_v56 = vmul.f32 %v2669_v18, %v3849_v6 }
 0x119   : > { %v662_v58 = vsel %vm584_vm1, %v660_v39, %v661_v34  ;;  %v1932_v41 = vadd.f32 %v1843_v49, %v1688_v14  ;;  %v1149_v51 = vrot.slane %v4333_v30, 1  ;;  %v4344_v42 = vmul.f32 %v2669_v18, %v3886_v13 }
 0x11a   : > { %v727_v7 = vadd.f32 %v662_v58, %v482_v40  ;;  %v906_v28 = vsel %vm584_vm1, %v904_v37, %v905_v59  ;;  %v1393_v45 = vrot.slane %v1266_v56, 2  ;;  %v1511_v1 = vmul.f32 %v2671_v19, %v4071_v61 }
 0x11b   : > { %v4353_v38 = vmul.f32 %v2671_v19, %v4108_v29  ;;  %2505 = vmatprep.mubr.msk.f32.mxu0 %vm1958_vm3, %v1932_v41  ;;  %v1150_v55 = vsel %vm584_vm1, %v1148_v44, %v1149_v51  ;;  %v1394_v24 = vrot.slane %v4344_v42, 2  ;;  %v1755_v49 = vmul.f32 %v2738_v57, %v274_v47 }
 0x11c   : > { %v971_v6 = vadd.f32 %v906_v28, %v727_v7  ;;  %v1637_v48 = vrot.slane %v1511_v1, 2  ;;  %v4363_v61 = vmul.f32 %v2738_v57, %v275_v8  ;;  %v299_v39 = vmul.f32 %v2652_v9, %v3812_v60  ;;  %v2564_v28 = vld [vmem:[%s2650_s30 + $0xe8] sm:$0x3] }
 0x11d   : > { %v1638_v53 = vrot.slane %v4353_v38, 2  ;;  %v1395_v14 = vsel %vm1317_vm2, %v1393_v45, %v1394_v24  ;;  %v1881_v40 = vrot.slane %v1755_v49, 2  ;;  %v367_v37 = vmul.f32 %v4039_v3, %v2654_v10 }
 0x11e   : > { %v1215_v27 = vadd.f32 %v1150_v55, %v971_v6  ;;  %v4583_v58 = vrot.slane %v4363_v61, 2  ;;  %v435_v44 = vmul.f32 %v4257_v25, %v2656_v11  ;;  %v511_v60 = vmul.f32 %v2658_v12, %v3931_v5 }
 0x11f   : > { %v1639_v47 = vsel %vm1317_vm2, %v1637_v48, %v1638_v53  ;;  %v399_v41 = vadd.f32 %v367_v37, %v299_v39  ;;  %v756_v7 = vmul.f32 %v4168_v21, %v2665_v16  ;;  %v1000_v3 = vmul.f32 %v2564_v28, %v2667_v17 }
 0x120   : > { %v1460_v56 = vadd.f32 %v1395_v14, %v1215_v27  ;;  %v1883_v45 = vsel %vm1317_vm2, %v1881_v40, %v4583_v58  ;;  %v623_v1 = vrot.slane %v511_v60, 1  ;;  %v1244_v25 = vmul.f32 %v2669_v18, %v3931_v5 }
 0x121   : > { %v1489_v6 = vmul.f32 %v4168_v21, %v2671_v19  ;;  %v467_v49 = vadd.f32 %v435_v44, %v399_v41  ;;  %v867_v48 = vrot.slane %v756_v7, 1  ;;  %v1111_v39 = vrot.slane %v1000_v3, 1  ;;  %v276_v21 = vld [vmem:[%s2650_s30 + $0x1a8] sm:$0x3] }
 0x122   : > { %v1704_v55 = vadd.f32 %v1639_v47, %v1460_v56  ;;  %v624_v27 = vsel %vm584_vm1, %v621_v4, %v623_v1  ;;  %v1356_v14 = vrot.slane %v1244_v25, 2  ;;  %v1733_v37 = vmul.f32 %v2564_v28, %v2738_v57 }
 0x123   : > { %v451_v40 = vmul.f32 %v2656_v11, %v275_v8  ;;  %v712_v58 = vadd.f32 %v624_v27, %v467_v49  ;;  %v868_v5 = vsel %vm584_vm1, %v865_v32, %v867_v48  ;;  %v1112_v47 = vsel %vm584_vm1, %v1109_v31, %v1111_v39 }
 0x124   : > { %v1948_v60 = vadd.f32 %v1883_v45, %v1704_v55  ;;  %v1600_v44 = vrot.slane %v1489_v6, 2  ;;  %v1844_v46 = vrot.slane %v1733_v37, 2  ;;  %v315_v4 = vmul.f32 %v2652_v9, %v3886_v13 }
 0x125   : > { %v956_v11 = vadd.f32 %v868_v5, %v712_v58  ;;  %v383_v8 = vmul.f32 %v2654_v10, %v4108_v29  ;;  %v535_v20 = vmul.f32 %v2658_v12, %v3966_v15  ;;  %v780_v32 = vmul.f32 %v2665_v16, %v4188_v36 }
 0x126   : > { %2529 = vmatprep.mubr.msk.f32.mxu1 %vm1958_vm3, %v1948_v60  ;;  %v1357_v52 = vsel %vm1317_vm2, %v1354_v63, %v1356_v14  ;;  %v1024_v31 = vmul.f32 %v2667_v17, %v276_v21  ;;  %v1268_v9 = vmul.f32 %v2669_v18, %v3966_v15  ;;  %v1513_v13 = vmul.f32 %v2671_v19, %v4188_v36  ;;  %v4427_v17 = vld [vmem:[%s4570_s3] ss:$0 sm:$0xff] }
 0x127   : > { %v1200_v58 = vadd.f32 %v1112_v47, %v956_v11  ;;  %v415_v10 = vadd.f32 %v383_v8, %v315_v4  ;;  %v663_v29 = vrot.slane %v535_v20, 1  ;;  %v907_v56 = vrot.slane %v780_v32, 1 }
 0x128   : > { %v1601_v12 = vsel %vm1317_vm2, %v1598_v33, %v1600_v44  ;;  %v1151_v16 = vrot.slane %v1024_v31, 1  ;;  %v1845_v18 = vsel %vm1317_vm2, %v1842_v2, %v1844_v46  ;;  %v1396_v63 = vrot.slane %v1268_v9, 2 }
 0x129   : > { %v1445_v50 = vadd.f32 %v1357_v52, %v1200_v58  ;;  %v483_v19 = vadd.f32 %v451_v40, %v415_v10  ;;  %v664_v15 = vsel %vm584_vm1, %v661_v34, %v663_v29  ;;  %v908_v36 = vsel %vm584_vm1, %v905_v59, %v907_v56 }
 0x12a   : > { %v1640_v23 = vrot.slane %v1513_v13, 2  ;;  %v1757_v33 = vmul.f32 %v2738_v57, %v276_v21  ;;  %v2131_v26 = vadd.f32 %v4263_v35, %v4427_v17  ;;  %v1152_v34 = vsel %vm584_vm1, %v1149_v51, %v1151_v16 }
 0x12b   : > { %v1689_v22 = vadd.f32 %v1601_v12, %v1445_v50  ;;  %v728_v2 = vadd.f32 %v664_v15, %v483_v19  ;;  %v2211_v57 = vadd.f32 %v4316_v62, %v4427_v17  ;;  %v2126_v0 = vadd.f32 %v4427_v17, %v4267_v54 }
 0x12c   : > { %v2206_v59 = vadd.f32 %v4427_v17, %v4323_v43  ;;  %2286 = vst.msk [vmem:[%s4442_s10 + $0x8] sm:$0xff] %vm2284_vm4, %v2131_v26  ;;  %v1397_v35 = vsel %vm1317_vm2, %v1394_v24, %v1396_v63  ;;  %v1884_v30 = vrot.slane %v1757_v33, 2  ;;  %v1641_v62 = vsel %vm1317_vm2, %v1638_v53, %v1640_v23 }
 0x12d   : > { %v1933_v41 = vadd.f32 %v1845_v18, %v1689_v22  ;;  %v972_v7 = vadd.f32 %v908_v36, %v728_v2  ;;  %2302 = vst.msk [vmem:[%s4442_s10 + $0x88] sm:$0xff] %vm2284_vm4, %v2211_v57  ;;  %2285 = vst.msk [vmem:[%s4442_s10] sm:$0xff] %vm2284_vm4, %v2126_v0  ;;  %v4595_v28 = vrot.slane %v4363_v61, 2 }
 0x12e   : > { %2301 = vst.msk [vmem:[%s4442_s10 + $0x80] sm:$0xff] %vm2284_vm4, %v2206_v59  ;;  %v2489_v43 = vpop.f32.mrb[2].mxu0 }
 0x12f   : > { %2506 = vmatmul.mubr.msk.f32.gmra.mrb[14].mxu0 %vm1958_vm3, %v1933_v41  ;;  %v1216_v54 = vadd.f32 %v1152_v34, %v972_v7  ;;  %v2141_v42 = vadd.f32 %v2489_v43, %v4427_v17  ;;  %v2135_v24 = vpop.f32.mrb[3].mxu0  ;;  %v1885_v3 = vsel %vm1317_vm2, %v4595_v28, %v1884_v30 }
 0x130   : > { %v2136_v45 = vadd.f32 %v4427_v17, %v2135_v24 }
 0x131   : > { %v1461_v51 = vadd.f32 %v1397_v35, %v1216_v54  ;;  %2288 = vst.msk [vmem:[%s4442_s10 + $0x18] sm:$0xff] %vm2284_vm4, %v2141_v42 }
 0x132   : > { %2287 = vst.msk [vmem:[%s4442_s10 + $0x10] sm:$0xff] %vm2284_vm4, %v2136_v45 }
 0x133   : > { %v1705_v1 = vadd.f32 %v1641_v62, %v1461_v51 }
 0x135   : > { %v1949_v38 = vadd.f32 %v1885_v3, %v1705_v1  ;;  %v2513_v53 = vpop.f32.mrb[2].mxu1 }
 0x136   : > { %v2221_v25 = vadd.f32 %v2513_v53, %v4427_v17  ;;  %v2215_v61 = vpop.f32.mrb[3].mxu1 }
 0x137   : > { %2530 = vmatmul.mubr.msk.f32.gmra.mrb[14].mxu1 %vm1958_vm3, %v1949_v38  ;;  %v2216_v6 = vadd.f32 %v4427_v17, %v2215_v61 }
 0x138   : > { %2304 = vst.msk [vmem:[%s4442_s10 + $0x98] sm:$0xff] %vm2284_vm4, %v2221_v25 }
 0x139   : > { %2303 = vst.msk [vmem:[%s4442_s10 + $0x90] sm:$0xff] %vm2284_vm4, %v2216_v6 }
 0x152   : > { %v2492_v55 = vpop.f32.mrb[4].mxu0 }
 0x153   : > { %v2151_v49 = vadd.f32 %v2492_v55, %v4427_v17  ;;  %v2145_v48 = vpop.f32.mrb[5].mxu0 }
 0x154   : > { %v2146_v39 = vadd.f32 %v4427_v17, %v2145_v48 }
 0x155   : > { %2290 = vst.msk [vmem:[%s4442_s10 + $0x28] sm:$0xff] %vm2284_vm4, %v2151_v49 }
 0x156   : > { %2289 = vst.msk [vmem:[%s4442_s10 + $0x20] sm:$0xff] %vm2284_vm4, %v2146_v39 }
 0x159   : > { %v2516_v27 = vpop.f32.mrb[4].mxu1 }
 0x15a   : > { %v2231_v14 = vadd.f32 %v2516_v27, %v4427_v17  ;;  %v2225_v37 = vpop.f32.mrb[5].mxu1 }
 0x15b   : > { %v2226_v40 = vadd.f32 %v4427_v17, %v2225_v37 }
 0x15c   : > { %2306 = vst.msk [vmem:[%s4442_s10 + $0xa8] sm:$0xff] %vm2284_vm4, %v2231_v14 }
 0x15d   : > { %2305 = vst.msk [vmem:[%s4442_s10 + $0xa0] sm:$0xff] %vm2284_vm4, %v2226_v40 }
 0x175   : > { %v2495_v60 = vpop.f32.mrb[6].mxu0 }
 0x176   : > { %v2161_v5 = vadd.f32 %v2495_v60, %v4427_v17  ;;  %v2155_v21 = vpop.f32.mrb[7].mxu0 }
 0x177   : > { %v2156_v47 = vadd.f32 %v4427_v17, %v2155_v21 }
 0x178   : > { %2292 = vst.msk [vmem:[%s4442_s10 + $0x38] sm:$0xff] %vm2284_vm4, %v2161_v5 }
 0x179   : > { %2291 = vst.msk [vmem:[%s4442_s10 + $0x30] sm:$0xff] %vm2284_vm4, %v2156_v47 }
 0x17c   : > { %v2519_v44 = vpop.f32.mrb[6].mxu1 }
 0x17d   : > { %v2241_v46 = vadd.f32 %v2519_v44, %v4427_v17  ;;  %v2235_v4 = vpop.f32.mrb[7].mxu1 }
 0x17e   : > { %v2236_v11 = vadd.f32 %v4427_v17, %v2235_v4 }
 0x17f   : > { %2308 = vst.msk [vmem:[%s4442_s10 + $0xb8] sm:$0xff] %vm2284_vm4, %v2241_v46 }
 0x180   : > { %2307 = vst.msk [vmem:[%s4442_s10 + $0xb0] sm:$0xff] %vm2284_vm4, %v2236_v11 }
 0x199   : > { %v2498_v8 = vpop.f32.mrb[8].mxu0 }
 0x19a   : > { %v2171_v20 = vadd.f32 %v2498_v8, %v4427_v17  ;;  %v2165_v32 = vpop.f32.mrb[9].mxu0 }
 0x19b   : > { %v2166_v52 = vadd.f32 %v4427_v17, %v2165_v32 }
 0x19c   : > { %2294 = vst.msk [vmem:[%s4442_s10 + $0x48] sm:$0xff] %vm2284_vm4, %v2171_v20 }
 0x19d   : > { %2293 = vst.msk [vmem:[%s4442_s10 + $0x40] sm:$0xff] %vm2284_vm4, %v2166_v52 }
 0x1a0   : > { %v2522_v31 = vpop.f32.mrb[8].mxu1 }
 0x1a1   : > { %v2251_v9 = vadd.f32 %v2522_v31, %v4427_v17  ;;  %v2245_v13 = vpop.f32.mrb[9].mxu1 }
 0x1a2   : > { %v2246_v58 = vadd.f32 %v4427_v17, %v2245_v13 }
 0x1a3   : > { %2310 = vst.msk [vmem:[%s4442_s10 + $0xc8] sm:$0xff] %vm2284_vm4, %v2251_v9 }
 0x1a4   : > { %2309 = vst.msk [vmem:[%s4442_s10 + $0xc0] sm:$0xff] %vm2284_vm4, %v2246_v58 }
 0x1bc   : > { %v2501_v10 = vpop.f32.mrb[10].mxu0 }
 0x1bd   : > { %v2181_v29 = vadd.f32 %v2501_v10, %v4427_v17  ;;  %v2175_v56 = vpop.f32.mrb[11].mxu0 }
 0x1be   : > { %v2176_v12 = vadd.f32 %v4427_v17, %v2175_v56 }
 0x1bf   : > { %2296 = vst.msk [vmem:[%s4442_s10 + $0x58] sm:$0xff] %vm2284_vm4, %v2181_v29 }
 0x1c0   : > { %2295 = vst.msk [vmem:[%s4442_s10 + $0x50] sm:$0xff] %vm2284_vm4, %v2176_v12 }
 0x1c3   : > { %v2525_v16 = vpop.f32.mrb[10].mxu1 }
 0x1c4   : > { %v2261_v50 = vadd.f32 %v2525_v16, %v4427_v17  ;;  %v2255_v18 = vpop.f32.mrb[11].mxu1 }
 0x1c5   : > { %v2256_v19 = vadd.f32 %v4427_v17, %v2255_v18 }
 0x1c6   : > { %2312 = vst.msk [vmem:[%s4442_s10 + $0xd8] sm:$0xff] %vm2284_vm4, %v2261_v50 }
 0x1c7   : > { %2311 = vst.msk [vmem:[%s4442_s10 + $0xd0] sm:$0xff] %vm2284_vm4, %v2256_v19 }
 0x1e0   : > { %v2504_v15 = vpop.f32.mrb[12].mxu0 }
 0x1e1   : > { %v2191_v36 = vadd.f32 %v2504_v15, %v4427_v17  ;;  %v2185_v63 = vpop.f32.mrb[13].mxu0 }
 0x1e2   : > { %v2186_v23 = vadd.f32 %v4427_v17, %v2185_v63 }
 0x1e3   : > { %2298 = vst.msk [vmem:[%s4442_s10 + $0x68] sm:$0xff] %vm2284_vm4, %v2191_v36 }
 0x1e4   : > { %2297 = vst.msk [vmem:[%s4442_s10 + $0x60] sm:$0xff] %vm2284_vm4, %v2186_v23 }
 0x1e7   : > { %v2528_v33 = vpop.f32.mrb[12].mxu1 }
 0x1e8   : > { %v2271_v22 = vadd.f32 %v2528_v33, %v4427_v17  ;;  %v2265_v2 = vpop.f32.mrb[13].mxu1 }
 0x1e9   : > { %v2266_v26 = vadd.f32 %v4427_v17, %v2265_v2 }
 0x1ea   : > { %2314 = vst.msk [vmem:[%s4442_s10 + $0xe8] sm:$0xff] %vm2284_vm4, %v2271_v22 }
 0x1eb   : > { %2313 = vst.msk [vmem:[%s4442_s10 + $0xe0] sm:$0xff] %vm2284_vm4, %v2266_v26 }
 0x202   : > { %v2507_v34 = vpop.f32.mrb[14].mxu0 }
 0x203   : > { %v2201_v57 = vadd.f32 %v2507_v34, %v4427_v17  ;;  %v2195_v0 = vpop.f32.mrb[15].mxu0 }
 0x204   : > { %v2196_v59 = vadd.f32 %v4427_v17, %v2195_v0 }
 0x205   : > { %2300 = vst.msk [vmem:[%s4442_s10 + $0x78] sm:$0xff] %vm2284_vm4, %v2201_v57 }
 0x206   : > { %2299 = vst.msk [vmem:[%s4442_s10 + $0x70] sm:$0xff] %vm2284_vm4, %v2196_v59 }
 0x20a   : > { %v2531_v41 = vpop.f32.mrb[14].mxu1 }
 0x20b   : > { %v2281_v7 = vadd.f32 %v2531_v41, %v4427_v17  ;;  %v2275_v35 = vpop.f32.mrb[15].mxu1 }
 0x20c   : > { %v2276_v30 = vadd.f32 %v4427_v17, %v2275_v35 }
 0x20d   : > { %2316 = vst.msk [vmem:[%s4442_s10 + $0xf8] sm:$0xff] %vm2284_vm4, %v2281_v7 }
 0x20e   : > { %2315 = vst.msk [vmem:[%s4442_s10 + $0xf0] sm:$0xff] %vm2284_vm4, %v2276_v30 }
 0x20f PF: > { %s14_s17 = sadd.s32 1, %s2587_s17   ;;  %s4596_s15 = smov %s2583_s16 }
 0x210   : > { %p11_p5 = scmp.ge.s32.totalorder %s14_s17, 4   ;;  %s4597_s16 = smov %s4599_s18 }
 0x212   :  { %13 = sbr.rel (!%p11_p5) target bundleno = 2 (0x2), region = 66 }

</bundles_post_ra>
